<compile_context>
chip_gen: v7x
topology: tpu7x:2x2x1
jax: 0.10.0
libtpu: 0.0.40
codegen_flags: <defaults>
</compile_context>

<pallas_src>
import jax
import jax.numpy as jnp
from jax import lax
from jax.experimental import pallas as pl
from jax.experimental.pallas import tpu as pltpu

EMB1 = 15           # embedding_size1
EMB2 = 9            # embedding_size2
LIN1 = 100          # linear_size1
LIN2 = 4            # linear_size2
HEADS = 3
BN_EPS = 1e-5
GAT_SLOPE = 0.2     # GATConv negative_slope default
LRELU_SLOPE = 0.01  # F.leaky_relu default


def _leaky(v, slope):
    return jnp.where(v > 0, v, slope * v)


def _batchnorm_train(v, gamma, beta):
    # BatchNorm1d forward, training mode, single pass over the node axis.
    mean = jnp.mean(v, axis=0, keepdims=True)
    msq = jnp.mean(v * v, axis=0, keepdims=True)
    var = jnp.maximum(msq - mean * mean, 0.0)
    return (v - mean) * lax.rsqrt(var + BN_EPS) * gamma + beta


def _pack_slab(entries):
    """Pack named 2-D f32 arrays row-wise into one lane-aligned (R, 128k) slab."""
    w = max(a.shape[1] for _, a in entries)
    w = ((w + 127) // 128) * 128
    offsets, rows, r = {}, [], 0
    for name, a in entries:
        a = jnp.asarray(a, jnp.float32)
        offsets[name] = (r, a.shape)
        rows.append(jnp.pad(a, ((0, 0), (0, w - a.shape[1]))))
        r += a.shape[0]
    return jnp.concatenate(rows, axis=0), offsets


def _bf16_softmax_ok():
    # bf16 VALU/EUP exist on v6e and newer; keep the N^2 softmax pipeline f32 on older chips.
    try:
        kind = jax.devices()[0].device_kind.lower()
    except Exception:
        return True
    return not any(old in kind for old in ("v2", "v3", "v4", "v5"))


def _vmem_limit_bytes(need):
    try:
        phys = pltpu.get_tpu_info().vmem_capacity_bytes
    except Exception:
        phys = 64 * 2**20
    return int(max(16 * 2**20, min(max(need, 32 * 2**20), phys - 4 * 2**20)))


def init_params(key, in_channels, out_channels, n_atoms):
    ks = jax.random.split(key, 18)

    def rn(k, shape, scale=0.1):
        return (scale * jax.random.normal(k, shape)).astype(jnp.float32)

    return dict(
        wgat=rn(ks[0], (in_channels, HEADS * EMB1)),     # GAT lin weight (pre-transposed)
        att_src=rn(ks[1], (HEADS, EMB1)),
        att_dst=rn(ks[2], (HEADS, EMB1)),
        bgat=rn(ks[3], (1, HEADS * EMB1)),
        w1=rn(ks[4], (HEADS * EMB1, EMB1)),              # head_transform1
        b1=rn(ks[5], (1, EMB1)),
        g1=jnp.ones((1, EMB1), jnp.float32),
        be1=jnp.zeros((1, EMB1), jnp.float32),
        wgcn=rn(ks[6], (EMB1, EMB2)),                    # GCN lin weight (pre-transposed)
        bgcn=rn(ks[7], (1, EMB2)),
        g2=jnp.ones((1, EMB2), jnp.float32),
        be2=jnp.zeros((1, EMB2), jnp.float32),
        wl1=rn(ks[8], (EMB2, LIN1)),
        bl1=rn(ks[9], (1, LIN1)),
        wl2=rn(ks[10], (LIN1, LIN2)),
        bl2=rn(ks[11], (1, LIN2)),
        wt=rn(ks[12], (LIN2 * n_atoms, out_channels)),   # transform (pre-transposed)
        bt=rn(ks[13], (1, out_channels)),
        wmu=rn(ks[14], (out_channels, out_channels)),
        bmu=rn(ks[15], (1, out_channels)),
        wls=rn(ks[16], (out_channels, out_channels)),
        bls=rn(ks[17], (1, out_channels)),
    )


def variational_gcn_encoder(params, x, edge_index, n_atoms, out_channels):
    N, Cin = x.shape
    B = N // n_atoms
    AL = n_atoms * LIN2
    C = out_channels

    # ---- host glue: dense adjacency adj[target, source] with self loops + GCN dinv
    src, dst = edge_index[0], edge_index[1]
    adj_f32 = jnp.zeros((N, N), jnp.float32).at[dst, src].set(1.0)
    adj_f32 = jnp.maximum(adj_f32, jnp.eye(N, dtype=jnp.float32))
    adj = adj_f32.astype(jnp.bfloat16)
    dinv = lax.rsqrt(jnp.sum(adj_f32, axis=1, keepdims=True))            # (N, 1) f32

    # ---- host glue: block-diagonal attention score matrices (head-batched dots)
    adst_blk = jnp.zeros((HEADS * EMB1, HEADS), jnp.float32)
    asrc_blk = jnp.zeros((HEADS, HEADS * EMB1), jnp.float32)
    for hd in range(HEADS):
        adst_blk = adst_blk.at[hd * EMB1:(hd + 1) * EMB1, hd].set(params['att_dst'][hd])
        asrc_blk = asrc_blk.at[hd, hd * EMB1:(hd + 1) * EMB1].set(params['att_src'][hd])

    # ---- host glue: GAT bias folded through head_transform1: (gat+bgat)@w1+b1
    b1p = jnp.dot(params['bgat'], params['w1']) + params['b1']           # (1, EMB1)

    # ---- host glue: reshape-free pooled head (exact 0/1 bf16 matrices)
    # transform(x4.reshape(B, n_atoms*LIN2)) == (pool @ ((x4 @ tileI) * sel)) @ wt + bt
    atom_of_node = jnp.arange(N) % n_atoms
    atom_of_col = jnp.arange(AL) // LIN2
    sel = (atom_of_node[:, None] == atom_of_col[None, :]).astype(jnp.bfloat16)   # (N, AL)
    tile_i = jnp.tile(jnp.eye(LIN2, dtype=jnp.float32), (1, n_atoms))            # (LIN2, AL)
    pool = (jnp.arange(B)[:, None] ==
            (jnp.arange(N)[None, :] // n_atoms)).astype(jnp.bfloat16)            # (B, N)

    slab, offs = _pack_slab([
        ("wgat", params['wgat']), ("adst", adst_blk), ("asrc", asrc_blk),
        ("w1", params['w1']), ("b1p", b1p),
        ("g1", params['g1']), ("be1", params['be1']),
        ("wgcn", params['wgcn']), ("bgcn", params['bgcn']),
        ("g2", params['g2']), ("be2", params['be2']),
        ("wl1", params['wl1']), ("bl1", params['bl1']),
        ("wl2", params['wl2']), ("bl2", params['bl2']),
        ("tile_i", tile_i), ("wt", params['wt']), ("bt", params['bt']),
        ("wmu", params['wmu']), ("bmu", params['bmu']),
        ("wls", params['wls']), ("bls", params['bls']),
    ])

    sdt = jnp.bfloat16 if _bf16_softmax_ok() else jnp.float32

    def kernel(x_ref, adj_ref, dinv_ref, pool_ref, sel_ref, slab_ref, mu_ref, ls_ref):
        def P(name):  # static slice into the packed parameter slab
            off, (r, c) = offs[name]
            return slab_ref[off:off + r, 0:c]

        xin = x_ref[...]                       # (N, Cin) f32
        adjm = adj_ref[...]                    # (N, N) bf16; adj[t, s]=1 iff edge s->t (+self)
        dinvv = dinv_ref[...]                  # (N, 1) f32
        n = adjm.shape[0]
        ones_col = jnp.ones((n, 1), jnp.float32)

        # ---- GATConv(in, 15, heads=3) fused with head_transform1 ------------------------
        h = jnp.dot(xin, P("wgat"), preferred_element_type=jnp.float32)        # (N, 45)
        a_dst = jnp.dot(h, P("adst"), preferred_element_type=jnp.float32)      # (N, H)
        a_src = lax.dot_general(P("asrc"), h, (((1,), (1,)), ((), ())),
                                preferred_element_type=jnp.float32)            # (H, N)
        w1 = P("w1")                                                            # (45, 15)

        y = jnp.zeros((n, EMB1), jnp.float32)
        for hd in range(HEADS):
            # value path: (attn @ h_h) @ w1_hd == attn @ (h_h @ w1_hd); per-row rinv commutes
            hw = jnp.dot(h[:, hd * EMB1:(hd + 1) * EMB1],
                         w1[hd * EMB1:(hd + 1) * EMB1, :],
                         preferred_element_type=jnp.float32)                   # (N, 15)
            aug = jnp.concatenate([hw, ones_col], axis=1).astype(jnp.bfloat16)  # (N, 16)

            # scores + masked softmax numerator (bf16 temps on v6e/v7x, f32 on v5e)
            raw = a_dst[:, hd:hd + 1].astype(sdt) + a_src[hd:hd + 1, :].astype(sdt)
            e = jnp.where(adjm > 0, _leaky(raw, GAT_SLOPE), jnp.asarray(-1e30, sdt))
            p = jnp.exp(e - jnp.max(e, axis=1, keepdims=True)).astype(jnp.bfloat16)

            # one MXU pass/head: 15-wide numerator + softmax row-sum in lane 15
            out = jnp.dot(p, aug, preferred_element_type=jnp.float32)          # (N, 16)
            rinv = pl.reciprocal(out[:, EMB1:EMB1 + 1], approx=True)
            y = y + out[:, :EMB1] * rinv

        y = _batchnorm_train(y + P("b1p"), P("g1"), P("be1"))                  # bn1

        # ---- GCNConv(15, 9): dinv * (A @ (dinv * (y @ W))) + b (dinv precomputed) -------
        xw = jnp.dot(y, P("wgcn"), preferred_element_type=jnp.float32)         # (N, 9)
        agg = jnp.dot(adjm, (xw * dinvv).astype(jnp.bfloat16),
                      preferred_element_type=jnp.float32)                      # (N, 9)
        z = _batchnorm_train(agg * dinvv + P("bgcn"), P("g2"), P("be2"))       # bn2

        # ---- linear1 -> leaky -> linear2 -> leaky (bf16 in / f32 accumulate) ------------
        z = _leaky(jnp.dot(z.astype(jnp.bfloat16), P("wl1").astype(jnp.bfloat16),
                           preferred_element_type=jnp.float32) + P("bl1"), LRELU_SLOPE)
        x4 = _leaky(jnp.dot(z.astype(jnp.bfloat16), P("wl2").astype(jnp.bfloat16),
                            preferred_element_type=jnp.float32) + P("bl2"), LRELU_SLOPE)

        # ---- fused pooled head: transform -> leaky -> (mu, logstd), reshape-free --------
        t_big = jnp.dot(x4.astype(jnp.bfloat16), P("tile_i").astype(jnp.bfloat16),
                        preferred_element_type=jnp.float32).astype(jnp.bfloat16)
        t_big = t_big * sel_ref[...]                                           # (N, AL) bf16
        pooled = jnp.dot(pool_ref[...], t_big,
                         preferred_element_type=jnp.float32)                   # (B, AL) f32
        tr = _leaky(jnp.dot(pooled, P("wt"),
                            preferred_element_type=jnp.float32) + P("bt"), LRELU_SLOPE)
        mu_ref[...] = jnp.dot(tr, P("wmu"),
                              preferred_element_type=jnp.float32) + P("bmu")
        ls_ref[...] = jnp.dot(tr, P("wls"),
                              preferred_element_type=jnp.float32) + P("bls")

    vmem = pl.BlockSpec(memory_space=pltpu.MemorySpace.VMEM)

    # VMEM budget: bf16 adj + a few N x N softmax temporaries + masks + fixed headroom,
    # capped safely below physical VMEM (v7x: 64 MiB).
    sbytes = 2 if sdt == jnp.bfloat16 else 4
    need = (2 * N * N + 4 * sbytes * N * N
            + 2 * N * AL + 2 * B * N + 4 * int(slab.size) + 8 * 2**20)
    vmem_bytes = _vmem_limit_bytes(need)

    flops = int(
        2 * N * Cin * HEADS * EMB1
        + 2 * 2 * N * HEADS * EMB1 * HEADS
        + HEADS * (2 * N * EMB1 * EMB1 + 2 * N * N * (EMB1 + 1))
        + 2 * N * EMB1 * EMB2 + 2 * N * N * EMB2
        + 2 * N * (EMB2 * LIN1 + LIN1 * LIN2)
        + 2 * N * LIN2 * AL + 2 * B * N * AL
        + 2 * B * (AL * C + 2 * C * C))
    transcendentals = int(HEADS * N * N + HEADS * N)
    bytes_accessed = int(2 * N * N + 4 * N * Cin + 4 * N + 2 * B * N + 2 * N * AL
                         + 4 * int(slab.size) + 8 * B * C)

    mu, logstd = pl.pallas_call(
        kernel,
        out_shape=(jax.ShapeDtypeStruct((B, C), jnp.float32),
                   jax.ShapeDtypeStruct((B, C), jnp.float32)),
        in_specs=[vmem, vmem, vmem, vmem, vmem, vmem],
        out_specs=(vmem, vmem),
        compiler_params=pltpu.CompilerParams(vmem_limit_bytes=vmem_bytes),
        cost_estimate=pl.CostEstimate(flops=flops,
                                      transcendentals=transcendentals,
                                      bytes_accessed=bytes_accessed),
    )(x.astype(jnp.float32), adj, dinv, pool, sel, slab)

    return mu, logstd, edge_index


if __name__ == "__main__":
    key = jax.random.PRNGKey(0)
    in_channels, out_channels = 4, 8
    batch_size, n_atoms = 2, 8
    N = batch_size * n_atoms

    kx, kp = jax.random.split(key)
    x = jax.random.normal(kx, (N, in_channels), dtype=jnp.float32)

    # ring graph inside each molecule, both directions
    edges = []
    for b in range(batch_size):
        off = b * n_atoms
        for a in range(n_atoms):
            edges.append((off + a, off + (a + 1) % n_atoms))          # src -> dst
            edges.append((off + (a + 1) % n_atoms, off + a))
    edge_index = jnp.array(list(zip(*edges)), dtype=jnp.int32)        # (2, E)

    params = init_params(kp, in_channels, out_channels, n_atoms)
    mu, logstd, ei = variational_gcn_encoder(params, x, edge_index, n_atoms, out_channels)
    jax.block_until_ready((mu, logstd))

    assert mu.shape == (batch_size, out_channels)
    assert logstd.shape == (batch_size, out_channels)
    assert ei.shape == edge_index.shape
    assert bool(jnp.all(jnp.isfinite(mu))) and bool(jnp.all(jnp.isfinite(logstd)))
    print("KERNEL_OK")
</pallas_src>

<mosaic_0001>
module attributes {stable_mosaic.version = 11 : i64} {
  func.func @kernel(%arg0: memref<16x4xf32, #tpu.memory_space<vmem>>, %arg1: memref<16x16xbf16, #tpu.memory_space<vmem>>, %arg2: memref<16x1xf32, #tpu.memory_space<vmem>>, %arg3: memref<2x16xbf16, #tpu.memory_space<vmem>>, %arg4: memref<16x32xbf16, #tpu.memory_space<vmem>>, %arg5: memref<284x128xf32, #tpu.memory_space<vmem>>, %arg6: memref<2x8xf32, #tpu.memory_space<vmem>>, %arg7: memref<2x8xf32, #tpu.memory_space<vmem>>) attributes {dimension_semantics = [], scalar_prefetch = 0 : i64, scratch_operands = 0 : i64, tpu.core_type = #tpu.core_type<tc>} {
    %c0 = arith.constant 0 : index
    %c0_0 = arith.constant 0 : index
    %0 = vector.load %arg0[%c0, %c0_0] : memref<16x4xf32, #tpu.memory_space<vmem>>, vector<16x4xf32>
    %c0_1 = arith.constant 0 : index
    %c0_2 = arith.constant 0 : index
    %1 = vector.load %arg1[%c0_1, %c0_2] : memref<16x16xbf16, #tpu.memory_space<vmem>>, vector<16x16xbf16>
    %c0_3 = arith.constant 0 : index
    %c0_4 = arith.constant 0 : index
    %2 = vector.load %arg2[%c0_3, %c0_4] : memref<16x1xf32, #tpu.memory_space<vmem>>, vector<16x1xf32>
    %cst = arith.constant 1.000000e+00 : f32
    %3 = vector.broadcast %cst : f32 to vector<16x1xf32>
    %c0_5 = arith.constant 0 : index
    %c0_6 = arith.constant 0 : index
    %4 = vector.load %arg5[%c0_5, %c0_6] : memref<284x128xf32, #tpu.memory_space<vmem>>, vector<4x45xf32>
    %cst_7 = arith.constant dense<0.000000e+00> : vector<16x45xf32>
    %5 = tpu.matmul %0, %4, %cst_7 {dimension_numbers = #tpu.dot_dimension_numbers<[1], [0], [0], [1], [0, 0, 1, 1], [], []>} : vector<16x4xf32>, vector<4x45xf32>, vector<16x45xf32> -> vector<16x45xf32>
    %c4 = arith.constant 4 : index
    %c0_8 = arith.constant 0 : index
    %6 = vector.load %arg5[%c4, %c0_8] : memref<284x128xf32, #tpu.memory_space<vmem>>, vector<45x3xf32>
    %cst_9 = arith.constant dense<0.000000e+00> : vector<16x3xf32>
    %7 = tpu.matmul %5, %6, %cst_9 {dimension_numbers = #tpu.dot_dimension_numbers<[1], [0], [0], [1], [0, 0, 1, 1], [], []>} : vector<16x45xf32>, vector<45x3xf32>, vector<16x3xf32> -> vector<16x3xf32>
    %c49 = arith.constant 49 : index
    %c0_10 = arith.constant 0 : index
    %8 = vector.load %arg5[%c49, %c0_10] : memref<284x128xf32, #tpu.memory_space<vmem>>, vector<3x45xf32>
    %cst_11 = arith.constant dense<0.000000e+00> : vector<3x16xf32>
    %9 = tpu.matmul %8, %5, %cst_11 {dimension_numbers = #tpu.dot_dimension_numbers<[1], [1], [0], [0], [0, 0, 1, 0], [], []>} : vector<3x45xf32>, vector<16x45xf32>, vector<3x16xf32> -> vector<3x16xf32>
    %c52 = arith.constant 52 : index
    %c0_12 = arith.constant 0 : index
    %10 = vector.load %arg5[%c52, %c0_12] : memref<284x128xf32, #tpu.memory_space<vmem>>, vector<45x15xf32>
    %cst_13 = arith.constant 0.000000e+00 : f32
    %11 = vector.broadcast %cst_13 : f32 to vector<16x15xf32>
    %12 = vector.extract_strided_slice %5 {offsets = [0, 0], sizes = [16, 15], strides = [1, 1]} : vector<16x45xf32> to vector<16x15xf32>
    %13 = vector.extract_strided_slice %10 {offsets = [0, 0], sizes = [15, 15], strides = [1, 1]} : vector<45x15xf32> to vector<15x15xf32>
    %cst_14 = arith.constant dense<0.000000e+00> : vector<16x15xf32>
    %14 = tpu.matmul %12, %13, %cst_14 {dimension_numbers = #tpu.dot_dimension_numbers<[1], [0], [0], [1], [0, 0, 1, 1], [], []>} : vector<16x15xf32>, vector<15x15xf32>, vector<16x15xf32> -> vector<16x15xf32>
    %15 = tpu.concatenate %14, %3 in 1 : vector<16x15xf32>, vector<16x1xf32> -> vector<16x16xf32>
    %16 = arith.truncf %15 : vector<16x16xf32> to vector<16x16xbf16>
    %17 = vector.extract_strided_slice %7 {offsets = [0, 0], sizes = [16, 1], strides = [1, 1]} : vector<16x3xf32> to vector<16x1xf32>
    %18 = arith.truncf %17 : vector<16x1xf32> to vector<16x1xbf16>
    %19 = vector.extract_strided_slice %9 {offsets = [0, 0], sizes = [1, 16], strides = [1, 1]} : vector<3x16xf32> to vector<1x16xf32>
    %20 = arith.truncf %19 : vector<1x16xf32> to vector<1x16xbf16>
    %21 = vector.broadcast %18 : vector<16x1xbf16> to vector<16x16xbf16>
    %22 = vector.broadcast %20 : vector<1x16xbf16> to vector<16x16xbf16>
    %23 = arith.addf %21, %22 : vector<16x16xbf16>
    %cst_15 = arith.constant 0.000000e+00 : bf16
    %24 = vector.broadcast %cst_15 : bf16 to vector<16x16xbf16>
    %25 = arith.cmpf ogt, %1, %24 : vector<16x16xbf16>
    %cst_16 = arith.constant 0.000000e+00 : bf16
    %26 = vector.broadcast %cst_16 : bf16 to vector<16x16xbf16>
    %27 = arith.cmpf ogt, %23, %26 : vector<16x16xbf16>
    %cst_17 = arith.constant 2.001950e-01 : bf16
    %28 = vector.broadcast %cst_17 : bf16 to vector<16x16xbf16>
    %29 = arith.mulf %28, %23 : vector<16x16xbf16>
    %30 = arith.select %27, %23, %29 : vector<16x16xi1>, vector<16x16xbf16>
    %cst_18 = arith.constant -1.000260e+30 : bf16
    %31 = vector.broadcast %cst_18 : bf16 to vector<16x16xbf16>
    %32 = arith.select %25, %30, %31 : vector<16x16xi1>, vector<16x16xbf16>
    %cst_19 = arith.constant dense<0xFF80> : vector<16xbf16>
    %33 = vector.multi_reduction <maximumf>, %32, %cst_19 [1] : vector<16x16xbf16> to vector<16xbf16>
    %34 = vector.shape_cast %33 : vector<16xbf16> to vector<16x1xbf16>
    %35 = vector.broadcast %34 : vector<16x1xbf16> to vector<16x16xbf16>
    %36 = arith.subf %32, %35 : vector<16x16xbf16>
    %37 = math.exp %36 : vector<16x16xbf16>
    %cst_20 = arith.constant dense<0.000000e+00> : vector<16x16xf32>
    %38 = tpu.matmul %37, %16, %cst_20 {dimension_numbers = #tpu.dot_dimension_numbers<[1], [0], [0], [1], [0, 0, 1, 1], [], []>} : vector<16x16xbf16>, vector<16x16xbf16>, vector<16x16xf32> -> vector<16x16xf32>
    %39 = vector.extract_strided_slice %38 {offsets = [0, 15], sizes = [16, 1], strides = [1, 1]} : vector<16x16xf32> to vector<16x1xf32>
    %40 = tpu.reciprocal %39 {approx = true} : vector<16x1xf32> -> vector<16x1xf32>
    %41 = vector.extract_strided_slice %38 {offsets = [0, 0], sizes = [16, 15], strides = [1, 1]} : vector<16x16xf32> to vector<16x15xf32>
    %42 = vector.broadcast %40 : vector<16x1xf32> to vector<16x15xf32>
    %43 = arith.mulf %41, %42 : vector<16x15xf32>
    %44 = arith.addf %11, %43 : vector<16x15xf32>
    %45 = vector.extract_strided_slice %5 {offsets = [0, 15], sizes = [16, 15], strides = [1, 1]} : vector<16x45xf32> to vector<16x15xf32>
    %46 = vector.extract_strided_slice %10 {offsets = [15, 0], sizes = [15, 15], strides = [1, 1]} : vector<45x15xf32> to vector<15x15xf32>
    %cst_21 = arith.constant dense<0.000000e+00> : vector<16x15xf32>
    %47 = tpu.matmul %45, %46, %cst_21 {dimension_numbers = #tpu.dot_dimension_numbers<[1], [0], [0], [1], [0, 0, 1, 1], [], []>} : vector<16x15xf32>, vector<15x15xf32>, vector<16x15xf32> -> vector<16x15xf32>
    %48 = tpu.concatenate %47, %3 in 1 : vector<16x15xf32>, vector<16x1xf32> -> vector<16x16xf32>
    %49 = arith.truncf %48 : vector<16x16xf32> to vector<16x16xbf16>
    %50 = vector.extract_strided_slice %7 {offsets = [0, 1], sizes = [16, 1], strides = [1, 1]} : vector<16x3xf32> to vector<16x1xf32>
    %51 = arith.truncf %50 : vector<16x1xf32> to vector<16x1xbf16>
    %52 = vector.extract_strided_slice %9 {offsets = [1, 0], sizes = [1, 16], strides = [1, 1]} : vector<3x16xf32> to vector<1x16xf32>
    %53 = arith.truncf %52 : vector<1x16xf32> to vector<1x16xbf16>
    %54 = vector.broadcast %51 : vector<16x1xbf16> to vector<16x16xbf16>
    %55 = vector.broadcast %53 : vector<1x16xbf16> to vector<16x16xbf16>
    %56 = arith.addf %54, %55 : vector<16x16xbf16>
    %cst_22 = arith.constant 0.000000e+00 : bf16
    %57 = vector.broadcast %cst_22 : bf16 to vector<16x16xbf16>
    %58 = arith.cmpf ogt, %1, %57 : vector<16x16xbf16>
    %cst_23 = arith.constant 0.000000e+00 : bf16
    %59 = vector.broadcast %cst_23 : bf16 to vector<16x16xbf16>
    %60 = arith.cmpf ogt, %56, %59 : vector<16x16xbf16>
    %cst_24 = arith.constant 2.001950e-01 : bf16
    %61 = vector.broadcast %cst_24 : bf16 to vector<16x16xbf16>
    %62 = arith.mulf %61, %56 : vector<16x16xbf16>
    %63 = arith.select %60, %56, %62 : vector<16x16xi1>, vector<16x16xbf16>
    %cst_25 = arith.constant -1.000260e+30 : bf16
    %64 = vector.broadcast %cst_25 : bf16 to vector<16x16xbf16>
    %65 = arith.select %58, %63, %64 : vector<16x16xi1>, vector<16x16xbf16>
    %cst_26 = arith.constant dense<0xFF80> : vector<16xbf16>
    %66 = vector.multi_reduction <maximumf>, %65, %cst_26 [1] : vector<16x16xbf16> to vector<16xbf16>
    %67 = vector.shape_cast %66 : vector<16xbf16> to vector<16x1xbf16>
    %68 = vector.broadcast %67 : vector<16x1xbf16> to vector<16x16xbf16>
    %69 = arith.subf %65, %68 : vector<16x16xbf16>
    %70 = math.exp %69 : vector<16x16xbf16>
    %cst_27 = arith.constant dense<0.000000e+00> : vector<16x16xf32>
    %71 = tpu.matmul %70, %49, %cst_27 {dimension_numbers = #tpu.dot_dimension_numbers<[1], [0], [0], [1], [0, 0, 1, 1], [], []>} : vector<16x16xbf16>, vector<16x16xbf16>, vector<16x16xf32> -> vector<16x16xf32>
    %72 = vector.extract_strided_slice %71 {offsets = [0, 15], sizes = [16, 1], strides = [1, 1]} : vector<16x16xf32> to vector<16x1xf32>
    %73 = tpu.reciprocal %72 {approx = true} : vector<16x1xf32> -> vector<16x1xf32>
    %74 = vector.extract_strided_slice %71 {offsets = [0, 0], sizes = [16, 15], strides = [1, 1]} : vector<16x16xf32> to vector<16x15xf32>
    %75 = vector.broadcast %73 : vector<16x1xf32> to vector<16x15xf32>
    %76 = arith.mulf %74, %75 : vector<16x15xf32>
    %77 = arith.addf %44, %76 : vector<16x15xf32>
    %78 = vector.extract_strided_slice %5 {offsets = [0, 30], sizes = [16, 15], strides = [1, 1]} : vector<16x45xf32> to vector<16x15xf32>
    %79 = vector.extract_strided_slice %10 {offsets = [30, 0], sizes = [15, 15], strides = [1, 1]} : vector<45x15xf32> to vector<15x15xf32>
    %cst_28 = arith.constant dense<0.000000e+00> : vector<16x15xf32>
    %80 = tpu.matmul %78, %79, %cst_28 {dimension_numbers = #tpu.dot_dimension_numbers<[1], [0], [0], [1], [0, 0, 1, 1], [], []>} : vector<16x15xf32>, vector<15x15xf32>, vector<16x15xf32> -> vector<16x15xf32>
    %81 = tpu.concatenate %80, %3 in 1 : vector<16x15xf32>, vector<16x1xf32> -> vector<16x16xf32>
    %82 = arith.truncf %81 : vector<16x16xf32> to vector<16x16xbf16>
    %83 = vector.extract_strided_slice %7 {offsets = [0, 2], sizes = [16, 1], strides = [1, 1]} : vector<16x3xf32> to vector<16x1xf32>
    %84 = arith.truncf %83 : vector<16x1xf32> to vector<16x1xbf16>
    %85 = vector.extract_strided_slice %9 {offsets = [2, 0], sizes = [1, 16], strides = [1, 1]} : vector<3x16xf32> to vector<1x16xf32>
    %86 = arith.truncf %85 : vector<1x16xf32> to vector<1x16xbf16>
    %87 = vector.broadcast %84 : vector<16x1xbf16> to vector<16x16xbf16>
    %88 = vector.broadcast %86 : vector<1x16xbf16> to vector<16x16xbf16>
    %89 = arith.addf %87, %88 : vector<16x16xbf16>
    %cst_29 = arith.constant 0.000000e+00 : bf16
    %90 = vector.broadcast %cst_29 : bf16 to vector<16x16xbf16>
    %91 = arith.cmpf ogt, %1, %90 : vector<16x16xbf16>
    %cst_30 = arith.constant 0.000000e+00 : bf16
    %92 = vector.broadcast %cst_30 : bf16 to vector<16x16xbf16>
    %93 = arith.cmpf ogt, %89, %92 : vector<16x16xbf16>
    %cst_31 = arith.constant 2.001950e-01 : bf16
    %94 = vector.broadcast %cst_31 : bf16 to vector<16x16xbf16>
    %95 = arith.mulf %94, %89 : vector<16x16xbf16>
    %96 = arith.select %93, %89, %95 : vector<16x16xi1>, vector<16x16xbf16>
    %cst_32 = arith.constant -1.000260e+30 : bf16
    %97 = vector.broadcast %cst_32 : bf16 to vector<16x16xbf16>
    %98 = arith.select %91, %96, %97 : vector<16x16xi1>, vector<16x16xbf16>
    %cst_33 = arith.constant dense<0xFF80> : vector<16xbf16>
    %99 = vector.multi_reduction <maximumf>, %98, %cst_33 [1] : vector<16x16xbf16> to vector<16xbf16>
    %100 = vector.shape_cast %99 : vector<16xbf16> to vector<16x1xbf16>
    %101 = vector.broadcast %100 : vector<16x1xbf16> to vector<16x16xbf16>
    %102 = arith.subf %98, %101 : vector<16x16xbf16>
    %103 = math.exp %102 : vector<16x16xbf16>
    %cst_34 = arith.constant dense<0.000000e+00> : vector<16x16xf32>
    %104 = tpu.matmul %103, %82, %cst_34 {dimension_numbers = #tpu.dot_dimension_numbers<[1], [0], [0], [1], [0, 0, 1, 1], [], []>} : vector<16x16xbf16>, vector<16x16xbf16>, vector<16x16xf32> -> vector<16x16xf32>
    %105 = vector.extract_strided_slice %104 {offsets = [0, 15], sizes = [16, 1], strides = [1, 1]} : vector<16x16xf32> to vector<16x1xf32>
    %106 = tpu.reciprocal %105 {approx = true} : vector<16x1xf32> -> vector<16x1xf32>
    %107 = vector.extract_strided_slice %104 {offsets = [0, 0], sizes = [16, 15], strides = [1, 1]} : vector<16x16xf32> to vector<16x15xf32>
    %108 = vector.broadcast %106 : vector<16x1xf32> to vector<16x15xf32>
    %109 = arith.mulf %107, %108 : vector<16x15xf32>
    %110 = arith.addf %77, %109 : vector<16x15xf32>
    %c97 = arith.constant 97 : index
    %c0_35 = arith.constant 0 : index
    %111 = vector.load %arg5[%c97, %c0_35] : memref<284x128xf32, #tpu.memory_space<vmem>>, vector<1x15xf32>
    %112 = vector.broadcast %111 : vector<1x15xf32> to vector<16x15xf32>
    %113 = arith.addf %110, %112 : vector<16x15xf32>
    %c98 = arith.constant 98 : index
    %c0_36 = arith.constant 0 : index
    %114 = vector.load %arg5[%c98, %c0_36] : memref<284x128xf32, #tpu.memory_space<vmem>>, vector<1x15xf32>
    %c99 = arith.constant 99 : index
    %c0_37 = arith.constant 0 : index
    %115 = vector.load %arg5[%c99, %c0_37] : memref<284x128xf32, #tpu.memory_space<vmem>>, vector<1x15xf32>
    %cst_38 = arith.constant dense<0.000000e+00> : vector<15xf32>
    %116 = vector.multi_reduction <add>, %113, %cst_38 [0] : vector<16x15xf32> to vector<15xf32>
    %117 = vector.shape_cast %116 : vector<15xf32> to vector<1x15xf32>
    %cst_39 = arith.constant 1.600000e+01 : f32
    %118 = vector.broadcast %cst_39 : f32 to vector<1x15xf32>
    %119 = arith.divf %117, %118 : vector<1x15xf32>
    %120 = arith.mulf %113, %113 : vector<16x15xf32>
    %cst_40 = arith.constant dense<0.000000e+00> : vector<15xf32>
    %121 = vector.multi_reduction <add>, %120, %cst_40 [0] : vector<16x15xf32> to vector<15xf32>
    %122 = vector.shape_cast %121 : vector<15xf32> to vector<1x15xf32>
    %cst_41 = arith.constant 1.600000e+01 : f32
    %123 = vector.broadcast %cst_41 : f32 to vector<1x15xf32>
    %124 = arith.divf %122, %123 : vector<1x15xf32>
    %125 = arith.mulf %119, %119 : vector<1x15xf32>
    %126 = arith.subf %124, %125 : vector<1x15xf32>
    %cst_42 = arith.constant 0.000000e+00 : f32
    %127 = vector.broadcast %cst_42 : f32 to vector<1x15xf32>
    %128 = arith.maximumf %126, %127 : vector<1x15xf32>
    %129 = vector.broadcast %119 : vector<1x15xf32> to vector<16x15xf32>
    %130 = arith.subf %113, %129 : vector<16x15xf32>
    %cst_43 = arith.constant 9.99999974E-6 : f32
    %131 = vector.broadcast %cst_43 : f32 to vector<1x15xf32>
    %132 = arith.addf %128, %131 : vector<1x15xf32>
    %133 = math.rsqrt %132 : vector<1x15xf32>
    %134 = vector.broadcast %133 : vector<1x15xf32> to vector<16x15xf32>
    %135 = arith.mulf %130, %134 : vector<16x15xf32>
    %136 = vector.broadcast %114 : vector<1x15xf32> to vector<16x15xf32>
    %137 = arith.mulf %135, %136 : vector<16x15xf32>
    %138 = vector.broadcast %115 : vector<1x15xf32> to vector<16x15xf32>
    %139 = arith.addf %137, %138 : vector<16x15xf32>
    %c100 = arith.constant 100 : index
    %c0_44 = arith.constant 0 : index
    %140 = vector.load %arg5[%c100, %c0_44] : memref<284x128xf32, #tpu.memory_space<vmem>>, vector<15x9xf32>
    %cst_45 = arith.constant dense<0.000000e+00> : vector<16x9xf32>
    %141 = tpu.matmul %139, %140, %cst_45 {dimension_numbers = #tpu.dot_dimension_numbers<[1], [0], [0], [1], [0, 0, 1, 1], [], []>} : vector<16x15xf32>, vector<15x9xf32>, vector<16x9xf32> -> vector<16x9xf32>
    %142 = vector.broadcast %2 : vector<16x1xf32> to vector<16x9xf32>
    %143 = arith.mulf %141, %142 : vector<16x9xf32>
    %144 = arith.truncf %143 : vector<16x9xf32> to vector<16x9xbf16>
    %cst_46 = arith.constant dense<0.000000e+00> : vector<16x9xf32>
    %145 = tpu.matmul %1, %144, %cst_46 {dimension_numbers = #tpu.dot_dimension_numbers<[1], [0], [0], [1], [0, 0, 1, 1], [], []>} : vector<16x16xbf16>, vector<16x9xbf16>, vector<16x9xf32> -> vector<16x9xf32>
    %146 = vector.broadcast %2 : vector<16x1xf32> to vector<16x9xf32>
    %147 = arith.mulf %145, %146 : vector<16x9xf32>
    %c115 = arith.constant 115 : index
    %c0_47 = arith.constant 0 : index
    %148 = vector.load %arg5[%c115, %c0_47] : memref<284x128xf32, #tpu.memory_space<vmem>>, vector<1x9xf32>
    %149 = vector.broadcast %148 : vector<1x9xf32> to vector<16x9xf32>
    %150 = arith.addf %147, %149 : vector<16x9xf32>
    %c116 = arith.constant 116 : index
    %c0_48 = arith.constant 0 : index
    %151 = vector.load %arg5[%c116, %c0_48] : memref<284x128xf32, #tpu.memory_space<vmem>>, vector<1x9xf32>
    %c117 = arith.constant 117 : index
    %c0_49 = arith.constant 0 : index
    %152 = vector.load %arg5[%c117, %c0_49] : memref<284x128xf32, #tpu.memory_space<vmem>>, vector<1x9xf32>
    %cst_50 = arith.constant dense<0.000000e+00> : vector<9xf32>
    %153 = vector.multi_reduction <add>, %150, %cst_50 [0] : vector<16x9xf32> to vector<9xf32>
    %154 = vector.shape_cast %153 : vector<9xf32> to vector<1x9xf32>
    %cst_51 = arith.constant 1.600000e+01 : f32
    %155 = vector.broadcast %cst_51 : f32 to vector<1x9xf32>
    %156 = arith.divf %154, %155 : vector<1x9xf32>
    %157 = arith.mulf %150, %150 : vector<16x9xf32>
    %cst_52 = arith.constant dense<0.000000e+00> : vector<9xf32>
    %158 = vector.multi_reduction <add>, %157, %cst_52 [0] : vector<16x9xf32> to vector<9xf32>
    %159 = vector.shape_cast %158 : vector<9xf32> to vector<1x9xf32>
    %cst_53 = arith.constant 1.600000e+01 : f32
    %160 = vector.broadcast %cst_53 : f32 to vector<1x9xf32>
    %161 = arith.divf %159, %160 : vector<1x9xf32>
    %162 = arith.mulf %156, %156 : vector<1x9xf32>
    %163 = arith.subf %161, %162 : vector<1x9xf32>
    %cst_54 = arith.constant 0.000000e+00 : f32
    %164 = vector.broadcast %cst_54 : f32 to vector<1x9xf32>
    %165 = arith.maximumf %163, %164 : vector<1x9xf32>
    %166 = vector.broadcast %156 : vector<1x9xf32> to vector<16x9xf32>
    %167 = arith.subf %150, %166 : vector<16x9xf32>
    %cst_55 = arith.constant 9.99999974E-6 : f32
    %168 = vector.broadcast %cst_55 : f32 to vector<1x9xf32>
    %169 = arith.addf %165, %168 : vector<1x9xf32>
    %170 = math.rsqrt %169 : vector<1x9xf32>
    %171 = vector.broadcast %170 : vector<1x9xf32> to vector<16x9xf32>
    %172 = arith.mulf %167, %171 : vector<16x9xf32>
    %173 = vector.broadcast %151 : vector<1x9xf32> to vector<16x9xf32>
    %174 = arith.mulf %172, %173 : vector<16x9xf32>
    %175 = vector.broadcast %152 : vector<1x9xf32> to vector<16x9xf32>
    %176 = arith.addf %174, %175 : vector<16x9xf32>
    %177 = arith.truncf %176 : vector<16x9xf32> to vector<16x9xbf16>
    %c118 = arith.constant 118 : index
    %c0_56 = arith.constant 0 : index
    %178 = vector.load %arg5[%c118, %c0_56] : memref<284x128xf32, #tpu.memory_space<vmem>>, vector<9x100xf32>
    %179 = arith.truncf %178 : vector<9x100xf32> to vector<9x100xbf16>
    %cst_57 = arith.constant dense<0.000000e+00> : vector<16x100xf32>
    %180 = tpu.matmul %177, %179, %cst_57 {dimension_numbers = #tpu.dot_dimension_numbers<[1], [0], [0], [1], [0, 0, 1, 1], [], []>} : vector<16x9xbf16>, vector<9x100xbf16>, vector<16x100xf32> -> vector<16x100xf32>
    %c127 = arith.constant 127 : index
    %c0_58 = arith.constant 0 : index
    %181 = vector.load %arg5[%c127, %c0_58] : memref<284x128xf32, #tpu.memory_space<vmem>>, vector<1x100xf32>
    %182 = vector.broadcast %181 : vector<1x100xf32> to vector<16x100xf32>
    %183 = arith.addf %180, %182 : vector<16x100xf32>
    %cst_59 = arith.constant 0.000000e+00 : f32
    %184 = vector.broadcast %cst_59 : f32 to vector<16x100xf32>
    %185 = arith.cmpf ogt, %183, %184 : vector<16x100xf32>
    %cst_60 = arith.constant 0.00999999977 : f32
    %186 = vector.broadcast %cst_60 : f32 to vector<16x100xf32>
    %187 = arith.mulf %186, %183 : vector<16x100xf32>
    %188 = arith.select %185, %183, %187 : vector<16x100xi1>, vector<16x100xf32>
    %189 = arith.truncf %188 : vector<16x100xf32> to vector<16x100xbf16>
    %c128 = arith.constant 128 : index
    %c0_61 = arith.constant 0 : index
    %190 = vector.load %arg5[%c128, %c0_61] : memref<284x128xf32, #tpu.memory_space<vmem>>, vector<100x4xf32>
    %191 = arith.truncf %190 : vector<100x4xf32> to vector<100x4xbf16>
    %cst_62 = arith.constant dense<0.000000e+00> : vector<16x4xf32>
    %192 = tpu.matmul %189, %191, %cst_62 {dimension_numbers = #tpu.dot_dimension_numbers<[1], [0], [0], [1], [0, 0, 1, 1], [], []>} : vector<16x100xbf16>, vector<100x4xbf16>, vector<16x4xf32> -> vector<16x4xf32>
    %c228 = arith.constant 228 : index
    %c0_63 = arith.constant 0 : index
    %193 = vector.load %arg5[%c228, %c0_63] : memref<284x128xf32, #tpu.memory_space<vmem>>, vector<1x4xf32>
    %194 = vector.broadcast %193 : vector<1x4xf32> to vector<16x4xf32>
    %195 = arith.addf %192, %194 : vector<16x4xf32>
    %cst_64 = arith.constant 0.000000e+00 : f32
    %196 = vector.broadcast %cst_64 : f32 to vector<16x4xf32>
    %197 = arith.cmpf ogt, %195, %196 : vector<16x4xf32>
    %cst_65 = arith.constant 0.00999999977 : f32
    %198 = vector.broadcast %cst_65 : f32 to vector<16x4xf32>
    %199 = arith.mulf %198, %195 : vector<16x4xf32>
    %200 = arith.select %197, %195, %199 : vector<16x4xi1>, vector<16x4xf32>
    %201 = arith.truncf %200 : vector<16x4xf32> to vector<16x4xbf16>
    %c229 = arith.constant 229 : index
    %c0_66 = arith.constant 0 : index
    %202 = vector.load %arg5[%c229, %c0_66] : memref<284x128xf32, #tpu.memory_space<vmem>>, vector<4x32xf32>
    %203 = arith.truncf %202 : vector<4x32xf32> to vector<4x32xbf16>
    %cst_67 = arith.constant dense<0.000000e+00> : vector<16x32xf32>
    %204 = tpu.matmul %201, %203, %cst_67 {dimension_numbers = #tpu.dot_dimension_numbers<[1], [0], [0], [1], [0, 0, 1, 1], [], []>} : vector<16x4xbf16>, vector<4x32xbf16>, vector<16x32xf32> -> vector<16x32xf32>
    %205 = arith.truncf %204 : vector<16x32xf32> to vector<16x32xbf16>
    %c0_68 = arith.constant 0 : index
    %c0_69 = arith.constant 0 : index
    %206 = vector.load %arg4[%c0_68, %c0_69] : memref<16x32xbf16, #tpu.memory_space<vmem>>, vector<16x32xbf16>
    %207 = arith.mulf %205, %206 : vector<16x32xbf16>
    %c0_70 = arith.constant 0 : index
    %c0_71 = arith.constant 0 : index
    %208 = vector.load %arg3[%c0_70, %c0_71] : memref<2x16xbf16, #tpu.memory_space<vmem>>, vector<2x16xbf16>
    %cst_72 = arith.constant dense<0.000000e+00> : vector<2x32xf32>
    %209 = tpu.matmul %208, %207, %cst_72 {dimension_numbers = #tpu.dot_dimension_numbers<[1], [0], [0], [1], [0, 0, 1, 1], [], []>} : vector<2x16xbf16>, vector<16x32xbf16>, vector<2x32xf32> -> vector<2x32xf32>
    %c233 = arith.constant 233 : index
    %c0_73 = arith.constant 0 : index
    %210 = vector.load %arg5[%c233, %c0_73] : memref<284x128xf32, #tpu.memory_space<vmem>>, vector<32x8xf32>
    %cst_74 = arith.constant dense<0.000000e+00> : vector<2x8xf32>
    %211 = tpu.matmul %209, %210, %cst_74 {dimension_numbers = #tpu.dot_dimension_numbers<[1], [0], [0], [1], [0, 0, 1, 1], [], []>} : vector<2x32xf32>, vector<32x8xf32>, vector<2x8xf32> -> vector<2x8xf32>
    %c265 = arith.constant 265 : index
    %c0_75 = arith.constant 0 : index
    %212 = vector.load %arg5[%c265, %c0_75] : memref<284x128xf32, #tpu.memory_space<vmem>>, vector<1x8xf32>
    %213 = vector.broadcast %212 : vector<1x8xf32> to vector<2x8xf32>
    %214 = arith.addf %211, %213 : vector<2x8xf32>
    %cst_76 = arith.constant 0.000000e+00 : f32
    %215 = vector.broadcast %cst_76 : f32 to vector<2x8xf32>
    %216 = arith.cmpf ogt, %214, %215 : vector<2x8xf32>
    %cst_77 = arith.constant 0.00999999977 : f32
    %217 = vector.broadcast %cst_77 : f32 to vector<2x8xf32>
    %218 = arith.mulf %217, %214 : vector<2x8xf32>
    %219 = arith.select %216, %214, %218 : vector<2x8xi1>, vector<2x8xf32>
    %c266 = arith.constant 266 : index
    %c0_78 = arith.constant 0 : index
    %220 = vector.load %arg5[%c266, %c0_78] : memref<284x128xf32, #tpu.memory_space<vmem>>, vector<8x8xf32>
    %cst_79 = arith.constant dense<0.000000e+00> : vector<2x8xf32>
    %221 = tpu.matmul %219, %220, %cst_79 {dimension_numbers = #tpu.dot_dimension_numbers<[1], [0], [0], [1], [0, 0, 1, 1], [], []>} : vector<2x8xf32>, vector<8x8xf32>, vector<2x8xf32> -> vector<2x8xf32>
    %c274 = arith.constant 274 : index
    %c0_80 = arith.constant 0 : index
    %222 = vector.load %arg5[%c274, %c0_80] : memref<284x128xf32, #tpu.memory_space<vmem>>, vector<1x8xf32>
    %223 = vector.broadcast %222 : vector<1x8xf32> to vector<2x8xf32>
    %224 = arith.addf %221, %223 : vector<2x8xf32>
    %c0_81 = arith.constant 0 : index
    %c0_82 = arith.constant 0 : index
    %225 = vector.load %arg6[%c0_81, %c0_82] : memref<2x8xf32, #tpu.memory_space<vmem>>, vector<2x8xf32>
    tpu.vector_store %arg6[%c0_81, %c0_82], %224 {strides = array<i32>} : memref<2x8xf32, #tpu.memory_space<vmem>>, vector<2x8xf32>,
    %c275 = arith.constant 275 : index
    %c0_83 = arith.constant 0 : index
    %226 = vector.load %arg5[%c275, %c0_83] : memref<284x128xf32, #tpu.memory_space<vmem>>, vector<8x8xf32>
    %cst_84 = arith.constant dense<0.000000e+00> : vector<2x8xf32>
    %227 = tpu.matmul %219, %226, %cst_84 {dimension_numbers = #tpu.dot_dimension_numbers<[1], [0], [0], [1], [0, 0, 1, 1], [], []>} : vector<2x8xf32>, vector<8x8xf32>, vector<2x8xf32> -> vector<2x8xf32>
    %c283 = arith.constant 283 : index
    %c0_85 = arith.constant 0 : index
    %228 = vector.load %arg5[%c283, %c0_85] : memref<284x128xf32, #tpu.memory_space<vmem>>, vector<1x8xf32>
    %229 = vector.broadcast %228 : vector<1x8xf32> to vector<2x8xf32>
    %230 = arith.addf %227, %229 : vector<2x8xf32>
    %c0_86 = arith.constant 0 : index
    %c0_87 = arith.constant 0 : index
    %231 = vector.load %arg7[%c0_86, %c0_87] : memref<2x8xf32, #tpu.memory_space<vmem>>, vector<2x8xf32>
    tpu.vector_store %arg7[%c0_86, %c0_87], %230 {strides = array<i32>} : memref<2x8xf32, #tpu.memory_space<vmem>>, vector<2x8xf32>,
    return
  }
}

</mosaic_0001>

<bundles_post_ra>
// kernel: tpu_custom_call.1
= control target key start
LH: loop header
LB: loop body
LE: loop exit
PB: predicated region body
PF: predicated region fallthrough
CT: control target
= control target key end

     0   :  { %13 = vsyncpa [#allocation3], 0  ;;  %s2449_s0 = inlined_call_operand.vmem [shape: f32[16,4], index: 0, kind: input, shape index: {}]   ;;  %s2450_s1 = inlined_call_operand.vmem [shape: bf16[16,16], index: 1, kind: input, shape index: {}]   ;;  %s2451_s2 = inlined_call_operand.vmem [shape: f32[16,1], index: 2, kind: input, shape index: {}]   ;;  %s2452_s3 = inlined_call_operand.vmem [shape: bf16[2,16], index: 3, kind: input, shape index: {}]   ;;  %s2453_s4 = inlined_call_operand.vmem [shape: bf16[16,32], index: 4, kind: input, shape index: {}]   ;;  %s2454_s5 = inlined_call_operand.hbm [shape: f32[284,128], index: 5, kind: input, shape index: {}]   ;;  %s2455_s6 = inlined_call_operand.hbm [shape: f32[2,8], index: 6, kind: output, shape index: {0}]   ;;  %s2456_s7 = inlined_call_operand.hbm [shape: f32[2,8], index: 7, kind: output, shape index: {1}]  }
   0x1   :  { %14 = vsyncpa [#allocation4], 0 }
   0x2   :  { %15 = vsyncpa [#allocation7], 0  ;;  %s2174_s24 = smov [#allocation2]   ;;  %s2102_s28 = scalar_lea.hbm %s2454_s5, 4608 }
   0x3   :  { %s31_s25 = sshll.u32 %s2174_s24, 4  ;;  %p2103_p0 = scmp.ne.s32.totalorder %s2454_s5, %s2102_s28  ;;  %s32_s25 = int_to_ptr.vmem [resolvable:$true] %s31_s25 }
   0x4   :  { %p2106_p1 = scmp.lt.u32.totalorder %s2102_s28, %s2454_s5 }
   0x6   :  { %p2108_p2 = pnand %p2106_p1, %p2103_p0 }
   0x8   :  { %2111 = shalt.err (!%p2108_p2)
}
   0x9   :  { %s2112_s10 = scalar_lea.vmem %s32_s25, 4608  ;;  %p2117_p4 = scmp.lt.s32.totalorder %s32_s25, %s32_s25 }
   0xa   :  { %p2113_p3 = scmp.ne.s32.totalorder %s32_s25, %s2112_s10  ;;  %p2118_p5 = scmp.lt.s32.totalorder %s2112_s10, %s2112_s10 }
   0xc   :  { %p2119_p6 = por %p2118_p5, %p2117_p4 }
   0xe   :  { %p2120_p7 = pnand %p2119_p6, %p2113_p3 }
  0x10   :  { %2123 = shalt.err (!%p2120_p7)
}
  0x11   :  { %s2175_s11 = smov 128   ;;  %s2176_s12 = smov 8  }
  0x12   :  { %37 = dma.hbm_to_vmem [thread:$0]  %s2454_s5, 4608, %s32_s25, [#allocation3], %s2175_s11, %s2175_s11, %s2176_s12  }
  0x13   :  { %2168 = dma.done.wait [#allocation3], 4608  }
  0x14   :  { %2169 = vsyncadd [#allocation3], 4294962688  ;;  %vm59_vm0 = vcmask 1043456   ;;  %v2177_v0 = vmov 65535   ;;  %vm151_vm1 = vcmask 1044480   ;;  %vm52_vm2 = vcmask 31744  }
  0x15   :  { %v1235_v1 = vsel %vm59_vm0, 4294967295, %v2177_v0  ;;  %v51_v3 = vld [vmem:[#allocation2] sm:$0xf]  ;;  %v45_v4 = vld [vmem:[%s2449_s0] sm:$0xff]  ;;  %v46_v5 = vld [vmem:[%s2449_s0 + $0x8] sm:$0xff]  ;;  %vm2178_vm3 = vmmov 1   ;;  %v407_v52 = vlaneseq }
  0x16   :  { %v2245_v2 = vsel %vm151_vm1, %v1235_v1, 0  ;;  %1863 = vmatprep.subr.msk.mxu0 %vm59_vm0, %v51_v3  ;;  %1865 = vmatprep.mubr.msk.f32.mxu0 %vm52_vm2, %v45_v4  ;;  %v138_v6 = vld [vmem:[#allocation2 + $0x4] sm:$0xff]  ;;  %v139_v7 = vld [vmem:[#allocation2 + $0xc] sm:$0xff]  ;;  %v140_v8 = vld [vmem:[#allocation2 + $0x14] sm:$0xff]  ;;  %v2179_v15 = vmov 0.0|0.0   ;;  %vm2180_vm5 = vmmov 0  }
  0x17   :  { %1864 = vmatpush3.msk.msra.mxu0 %vm59_vm0, %v51_v3  ;;  %v1999_v9 = vpack.c.bf16 %v139_v7, %v138_v6  ;;  %v141_v10 = vld [vmem:[#allocation2 + $0x1c] sm:$0xff]  ;;  %v142_v12 = vld [vmem:[#allocation2 + $0x24] sm:$0xff]  ;;  %v143_v13 = vld [vmem:[#allocation2 + $0x2c] sm:$0x1f]  ;;  %v2181_v16 = vmov 0.0   ;;  %vm144_vm6 = vcmask 367616  }
  0x18   :  { %1866 = vmatmul.mubr.msk.f32.vlgmr.msra.gmra.mrb[0].mxu0 %vm52_vm2, %v46_v5  ;;  %v2003_v11 = vpack.c.bf16 %v141_v10, %v140_v8  ;;  %v2007_v14 = vpack.c.bf16 %v143_v13, %v142_v12  ;;  %vm2008_vm4 = vmpackc.low %vm151_vm1, %vm2178_vm3  ;;  %2013 = vmatprep.subr.bf16.mxu0 %v2179_v15  ;;  %v304_v17 = vld [vmem:[#allocation2 + $0x34] sm:$0xff]  ;;  %v305_v18 = vld [vmem:[#allocation2 + $0x3c] sm:$0xff]  ;;  %vm315_vm7 = vcmask 1046528   ;;  %s2182_s0 = smov 113   ;;  %vm534_vm10 = vcmask 1040384   ;;  %s2183_s5 = smov 98  }
  0x19   :  { %2000 = vmatprep.subr.bf16.mxu1 %v1999_v9  ;;  %1887 = vmatprep.mubr.msk.f32.mxu0 %vm2180_vm5, %v2181_v16  ;;  %v306_v19 = vld [vmem:[#allocation2 + $0x44] sm:$0xff]  ;;  %v2261_v20 = vld [vmem:[#allocation2 + $0x4c] sm:$0xff]  ;;  %vm2015_vm8 = vmpackc.low %vm144_vm6, %vm144_vm6  ;;  %v2017_v23 = vpack.c.bf16 %v305_v18, %v304_v17  ;;  %v535_v26 = vrot.slane %v305_v18, 7  ;;  %vm310_vm11 = vcmask 121856   ;;  %v2184_v33 = vmov 1   ;;  %s2191_s29 = smov [#allocation6]  }
  0x1a   :  { %2002 = vmatpush3.bf16.msra.mxu1 %v1999_v9  ;;  %vm2266_vm9 = vmpackc.low %vm315_vm7, %vm2178_vm3  ;;  %v536_v27 = vrot.slane %v306_v19, 7  ;;  %v538_v28 = vrot.slane %v2261_v20, 7  ;;  %v230_v31 = vld [vmem:[#allocation2 + $0x31] sm:$0x7]  ;;  %2066 = vset.pattern.permute.xlu1 %v2184_v33  ;;  %v2185_v34 = vmov 0   ;;  %v2186_v40 = vmov 2  }
  0x1b   :  { %2004 = vmatprep.subr.bf16.mxu1 %v2003_v11  ;;  %2065 = vset.pattern.permute.xlu0 %v2185_v34  ;;  %v2297_v47 = vld [vmem:[%s2450_s1] sm:$0xf]  ;;  %v2302_v48 = vld [vmem:[%s2450_s1 + $0x4] sm:$0xf]  ;;  %v2308_v58 = vshrl.u32 %v407_v52, 7  ;;  %vm431_vm1 = vcmask 130048  }
  0x1c   :  { %v537_v29 = vsel %vm534_vm10, %v535_v26, %v536_v27  ;;  %v539_v30 = vsel %vm534_vm10, %v536_v27, %v538_v28  ;;  %v1784_v50 = vcombine.low %v2297_v47, %v2302_v48  ;;  %vm412_vm14 = vcmp.gt.bf16.partialorder %v2297_v47, 0  ;;  %v1294_v47 = vld [vmem:[#allocation2 + $0xb0] sm:$0xff]  ;;  %s1732_s30 = sshll.u32 %s2191_s29, 4  ;;  %s1733_s30 = int_to_ptr.vmem [resolvable:$true] %s1732_s30 }
  0x1d   :  { %v2023_v32 = vpack.c.bf16 %v539_v30, %v537_v29  ;;  %v409_v63 = vsub.s32 0, %v2308_v58  ;;  %v852_v6 = vsub.s32 1, %v2308_v58  ;;  %vm413_vm15 = vcmp.gt.bf16.partialorder %v2302_v48, 0  ;;  %v1295_v48 = vld [vmem:[#allocation2 + $0xb8] sm:$0xff] }
  0x1e   :  { %2006 = vmatpush3.bf16.msra.mxu1 %v2003_v11  ;;  %vm755_vm3 = vcmask 1041408   ;;  %v2187_v52 = vmov 839922192  }
  0x1f   :  { %2009 = vmatprep.subr.msk.bf16.mxu1 %vm2008_vm4, %v2007_v14 }
  0x22   :  { %2012 = vmatpush3.bf16.msk.msra.mxu1 %vm2008_vm4, %v2007_v14  ;;  %vm1179_vm4 = vcmask 72704  }
  0x23   :  { %1897 = vmatprep.subr.bf16.mxu1 %v2181_v16 }
  0xeb   :  { %v1867_v21 = vpop.f32.mrb[0].mxu0 }
  0xec   :  { %v129_v22 = vpop.f32.mrb[1].mxu0 }
  0xed   :  { %v2014_v25 = vpack.c.bf16 %v1867_v21, %v129_v22  ;;  %528 = vrot.lane.b32.xlu1 %v129_v22, %s2182_s0  ;;  %1880 = vmatprep.mubr.msk.f32.mxu1 %vm144_vm6, %v129_v22 }
  0xee   :  { %1881 = vmatmul.mubr.msk.f32.vlgmr.msra.gmra.mrb[0].mxu1 %vm144_vm6, %v1867_v21 }
  0xef   :  { %2016 = vmatpush3.bf16.xpose.msk.msra.mxu0 %vm2015_vm8, %v2014_v25  ;;  %1899 = vmatprep.mubr.msk.bf16.mxu1 %vm2180_vm5, %v2181_v16  ;;  %vm1313_vm8 = vcmask 818176  }
  0xf0   :  { %2019 = vmatprep.subr.msk.bf16.mxu0 %vm2266_vm9, %v2017_v23 }
  0xf1   :  { %530 = vrot.lane.b32.xlu1 %v1867_v21, %s2182_s0 }
  0xf5   :  { %749 = vrot.lane.b32.xlu1 %v129_v22, %s2183_s5 }
  0xf6   :  { %1888 = vmatmul.mubr.msk.f32.vlgmr.msra.gmra.mrb[2].mxu0 %vm144_vm6, %v230_v31 }
  0xf7   :  { %2022 = vmatpush3.bf16.msk.msra.mxu0 %vm2266_vm9, %v2017_v23  ;;  %1894 = vmatprep.mubr.msk.f32.mxu0 %vm310_vm11, %v129_v22 }
  0xf8   :  { %2025 = vmatprep.subr.msk.bf16.mxu0 %vm2266_vm9, %v2023_v32 }
  0xf9   :  { %751 = vrot.lane.b32.xlu1 %v1867_v21, %s2183_s5 }
  0xfa   :  { %1895 = vmatmul.mubr.msk.f32.vlgmr.msra.gmra.mrb[4].mxu0 %vm310_vm11, %v1867_v21 }
  0xfb   :  { %2028 = vmatpush3.bf16.msk.msra.mxu0 %vm2266_vm9, %v2023_v32 }
  0xfc   :  { %1910 = vmatprep.subr.bf16.mxu0 %v2181_v16 }
 0x15f   :  { %v529_v35 = vpop.permute.xlu1 %528 }
 0x160   :  { %1907 = vmatprep.mubr.msk.f32.mxu0 %vm310_vm11, %v529_v35 }
 0x163   :  { %v531_v36 = vpop.permute.xlu1 %530 }
 0x164   :  { %1908 = vmatmul.mubr.msk.f32.vlgmr.msra.gmra.mrb[6].mxu0 %vm310_vm11, %v531_v36 }
 0x165   :  { %1912 = vmatprep.mubr.msk.bf16.mxu0 %vm2180_vm5, %v2181_v16 }
 0x167   :  { %v2310_v59 = vpop.permute.xlu1 %749 }
 0x16b   :  { %v2313_v0 = vpop.permute.xlu1 %751 }
 0x1c1   :  { %v1882_v37 = vpop.f32.mrb[0].mxu1 }
 0x1c2   :  { %v221_v38 = vpop.f32.mrb[1].mxu1 }
 0x1c3   :  { %v397_v39 = vpack.c.bf16 %v1882_v37, %v221_v38 }
 0x1c5   :  { %626 = vperm.xlu1 %2066, %v397_v39   ;;  %401 = vperm.xlu0 %2065, %v397_v39  }
 0x1c9   :  { %2067 = vset.pattern.permute.xlu1 %v2186_v40  ;;  %v300_v41 = vpop.f32.mrb[2].mxu0 }
 0x1ca   :  { %847 = vperm.xlu1 %2067, %v397_v39   ;;  %v1889_v42 = vpop.f32.mrb[3].mxu0  ;;  %v398_v51 = vpack.c.bf16 %v300_v41, %v300_v41  ;;  %v308_v41 = vld [vmem:[#allocation2 + $0x54] sm:$0xff] }
 0x1cb   :  { %v309_v42 = vld [vmem:[#allocation2 + $0x5c] sm:$0x1f] }
 0x1cc   :  { %v629_v56 = vshrl.u32 %v398_v51, 16  ;;  %v405_v61 = vpack.i.b16 %v398_v51, %v398_v51 }
 0x1cd   :  { %v1896_v43 = vpop.f32.mrb[4].mxu0 }
 0x1ce   :  { %v395_v44 = vsel %vm310_vm11, %v1896_v43, 1.0  ;;  %v385_v45 = vpop.f32.mrb[5].mxu0  ;;  %v630_v62 = vpack.i.b16 %v629_v56, %v629_v56  ;;  %v410_v3 = vrot.slane %v405_v61, %v409_v63  ;;  %v853_v11 = vrot.slane %v405_v61, %v852_v6 }
 0x1cf   :  { %v394_v46 = vsel %vm310_vm11, %v385_v45, 1.0  ;;  %v756_v43 = vrot.slane %v2261_v20, 6  ;;  %v759_v45 = vrot.slane %v309_v42, 6  ;;  %v1225_v42 = vld [vmem:[#allocation2 + $0x7e] sm:$0x1] }
 0x1d0   :  { %v396_v49 = vpack.c.bf16 %v395_v44, %v394_v46  ;;  %v635_v1 = vrot.slane %v630_v62, %v409_v63  ;;  %v757_v44 = vrot.slane %v308_v41, 6  ;;  %v1224_v41 = vld [vmem:[#allocation2 + $0x76] sm:$0xff] }
 0x1d2   :  { %1898 = vmatpush3.bf16.msra.mxu1 %v396_v49  ;;  %v758_v46 = vsel %vm755_vm3, %v756_v43, %v757_v44  ;;  %v760_v49 = vsel %vm755_vm3, %v757_v44, %v759_v45  ;;  %v1226_v44 = vpack.c.bf16 %v1225_v42, %v1224_v41 }
 0x1d3   :  { %v2029_v51 = vpack.c.bf16 %v760_v49, %v758_v46 }
 0x1d5   :  { %2031 = vmatprep.subr.msk.bf16.mxu1 %vm2266_vm9, %v2029_v51 }
 0x237   :  { %v1909_v53 = vpop.f32.mrb[6].mxu0 }
 0x238   :  { %v623_v54 = vsel %vm310_vm11, %v1909_v53, 1.0  ;;  %v613_v55 = vpop.f32.mrb[7].mxu0  ;;  %v440_v53 = vunpack.c.l.s4 %v2187_v52 }
 0x239   :  { %v622_v57 = vsel %vm310_vm11, %v613_v55, 1.0 }
 0x23a   :  { %v624_v60 = vpack.c.bf16 %v623_v54, %v622_v57  ;;  %v2188_v54 = vmov 1985246804   ;;  %v441_v56 = vunpack.c.0.s8 %v440_v53 }
 0x23b   :  { %v447_v55 = vunpack.c.l.s4 %v2188_v54  ;;  %v1238_v54 = vand.u32 %v2245_v2, %v1226_v44 }
 0x23c   :  { %1911 = vmatpush3.bf16.msra.mxu0 %v624_v60  ;;  %v444_v60 = vsub.s32 %v441_v56, %v2308_v58 }
 0x23d   :  { %v448_v57 = vunpack.c.0.s8 %v447_v55 }
 0x23f   :  { %v451_v20 = vsub.s32 %v448_v57, %v2308_v58 }
 0x244   :  { %v627_v4 = vpop.permute.xlu1 %626  ;;  %v402_v5 = vpop.permute.xlu0 %401 }
 0x245   :  { %v636_v7 = vadd.bf16 %v635_v1, %v627_v4  ;;  %v411_v8 = vadd.bf16 %v410_v3, %v402_v5 }
 0x247   :  { %vm637_vm12 = vcmp.gt.bf16.partialorder %v636_v7, 0  ;;  %v638_v9 = vmul.bf16 1045249613, %v636_v7  ;;  %vm414_vm13 = vcmp.gt.bf16.partialorder %v411_v8, 0  ;;  %v415_v10 = vmul.bf16 1045249613, %v411_v8 }
 0x249   :  { %v639_v12 = vsel %vm637_vm12, %v636_v7, %v638_v9  ;;  %v416_v13 = vsel %vm414_vm13, %v411_v8, %v415_v10  ;;  %v848_v14 = vpop.permute.xlu1 %847  ;;  %vm1563_vm12 = vcmask 64512   ;;  %vm1637_vm13 = vcmask 58368  }
 0x24a   :  { %v854_v17 = vadd.bf16 %v853_v11, %v848_v14  ;;  %v1765_v18 = vcombine.low %v639_v12, %v639_v12  ;;  %v1766_v19 = vcombine.high %v639_v12, %v639_v12  ;;  %v1757_v21 = vcombine.low %v416_v13, %v416_v13 }
 0x24b   :  { %v1758_v22 = vcombine.high %v416_v13, %v416_v13 }
 0x24c   :  { %vm855_vm0 = vcmp.gt.bf16.partialorder %v854_v17, 0  ;;  %v856_v23 = vmul.bf16 1045249613, %v854_v17  ;;  %v647_v25 = vsel %vm412_vm14, %v1765_v18, 4048220490 }
 0x24d   :  { %v648_v26 = vsel %vm413_vm15, %v1766_v19, 4048220490  ;;  %v424_v27 = vsel %vm412_vm14, %v1757_v21, 4048220490  ;;  %v425_v28 = vsel %vm413_vm15, %v1758_v22, 4048220490 }
 0x24e   :  { %v857_v29 = vsel %vm855_vm0, %v854_v17, %v856_v23  ;;  %v1767_v30 = vcombine.low %v647_v25, %v648_v26  ;;  %v1759_v31 = vcombine.low %v424_v27, %v425_v28 }
 0x24f   :  { %v1773_v32 = vcombine.low %v857_v29, %v857_v29  ;;  %v1774_v33 = vcombine.high %v857_v29, %v857_v29 }
 0x250   :  { %v655_v35 = vsel %vm431_vm1, %v1767_v30, 4286644096  ;;  %v434_v36 = vsel %vm431_vm1, %v1759_v31, 4286644096 }
 0x251   :  { %657 = vmax.xlane.bf16.xlu1 %v655_v35  ;;  %436 = vmax.xlane.bf16.xlu0 %v434_v36  ;;  %v865_v37 = vsel %vm412_vm14, %v1773_v32, 4048220490  ;;  %v866_v38 = vsel %vm413_vm15, %v1774_v33, 4048220490  ;;  %v2189_v32 = vmov 15  }
 0x252   :  { %v1775_v39 = vcombine.low %v865_v37, %v866_v38  ;;  %2069 = vset.pattern.permute.xlu1 %v2189_v32  ;;  %2068 = vset.pattern.permute.xlu0 %v2189_v32 }
 0x254   :  { %v873_v40 = vsel %vm431_vm1, %v1775_v39, 4286644096 }
 0x259   :  { %875 = vmax.xlane.bf16.xlu0 %v873_v40 }
 0x2e2   :  { %v658_v61 = vpop.xlane.xlu1 %657  ;;  %v437_v62 = vpop.xlane.xlu0 %436 }
 0x2e3   :  { %v666_v63 = vrot.slane %v658_v61, %v444_v60  ;;  %v673_v1 = vrot.slane %v658_v61, %v451_v20  ;;  %v445_v3 = vrot.slane %v437_v62, %v444_v60  ;;  %v452_v4 = vrot.slane %v437_v62, %v451_v20 }
 0x2e5   :  { %v676_v5 = vsub.bf16 %v647_v25, %v666_v63  ;;  %v677_v6 = vsub.bf16 %v648_v26, %v673_v1  ;;  %v455_v7 = vsub.bf16 %v424_v27, %v445_v3  ;;  %v456_v8 = vsub.bf16 %v425_v28, %v452_v4 }
 0x2e7   :  { %v679_v9 = vmul.bf16 1069105081, %v676_v5  ;;  %v682_v10 = vmul.bf16 1069105081, %v677_v6  ;;  %v458_v11 = vmul.bf16 1069105081, %v455_v7 }
 0x2e8   :  { %v461_v12 = vmul.bf16 1069105081, %v456_v8 }
 0x2e9   :  { %2074 = vpow.bf16 %v679_v9 }
 0x2ea   :  { %2076 = vpow.bf16 %v682_v10  ;;  %v876_v13 = vpop.xlane.xlu0 %875  ;;  %v1020_v10 = vld [vmem:[#allocation2 + $0x64] sm:$0xff] }
 0x2eb   :  { %2078 = vpow.bf16 %v458_v11  ;;  %v884_v14 = vrot.slane %v876_v13, %v444_v60  ;;  %v891_v58 = vrot.slane %v876_v13, %v451_v20  ;;  %v1021_v11 = vld [vmem:[#allocation2 + $0x6c] sm:$0x7f]  ;;  %v50_v13 = vld [vmem:[%s2451_s2 + $0x8] sm:$0xff] }
 0x2ec   :  { %2080 = vpow.bf16 %v461_v12  ;;  %v2035_v12 = vpack.c.bf16 %v1021_v11, %v1020_v10  ;;  %v1289_v10 = vld [vmem:[#allocation2 + $0x88] sm:$0xff]  ;;  %v1290_v11 = vld [vmem:[#allocation2 + $0x90] sm:$0xff] }
 0x2ed   :  { %v894_v17 = vsub.bf16 %v865_v37, %v884_v14  ;;  %v895_v18 = vsub.bf16 %v866_v38, %v891_v58  ;;  %v49_v14 = vld [vmem:[%s2451_s2] sm:$0xff] }
 0x2ee   :  { %2037 = vmatprep.subr.msk.bf16.mxu0 %vm2266_vm9, %v2035_v12 }
 0x2ef   :  { %v897_v19 = vmul.bf16 1069105081, %v894_v17  ;;  %v900_v21 = vmul.bf16 1069105081, %v895_v18  ;;  %v1778_v17 = vld [vmem:[#allocation2 + $0x61] ss:$0 sm:$0xff] }
 0x2f1   :  { %2082 = vpow.bf16 %v897_v19 }
 0x2f2   :  { %2084 = vpow.bf16 %v900_v21 }
 0x2f4   :  { %v2075_v22 = vpop.eup %2074 }
 0x2f5   :  { %v2077_v23 = vpop.eup %2076 }
 0x2f6   :  { %v2079_v25 = vpop.eup %2078  ;;  %v1768_v26 = vcombine.low %v2075_v22, %v2077_v23 }
 0x2f7   :  { %v2081_v27 = vpop.eup %2080 }
 0x2f8   :  { %v1760_v28 = vcombine.low %v2079_v25, %v2081_v27  ;;  %1913 = vmatmul.mubr.msk.bf16.vlgmr.msra.gmra.mrb[8].mxu0 %vm431_vm1, %v1768_v26 }
 0x2f9   :  { %2040 = vmatpush3.bf16.msk.msra.mxu0 %vm2266_vm9, %v2035_v12 }
 0x2fa   :  { %1900 = vmatmul.mubr.msk.bf16.vlgmr.msra.gmra.mrb[4].mxu1 %vm431_vm1, %v1760_v28  ;;  %1936 = vmatprep.subr.bf16.mxu0 %v2181_v16 }
 0x2fb   :  { %1920 = vmatprep.mubr.msk.f32.mxu1 %vm310_vm11, %v2310_v59  ;;  %2034 = vmatpush3.bf16.msk.msra.mxu1 %vm2266_vm9, %v2029_v51 }
 0x2fc   :  { %v2083_v29 = vpop.eup %2082  ;;  %1923 = vmatprep.subr.bf16.mxu1 %v2181_v16 }
 0x2fd   :  { %v2085_v30 = vpop.eup %2084 }
 0x2fe   :  { %v1776_v31 = vcombine.low %v2083_v29, %v2085_v30 }
 0x302   :  { %1921 = vmatmul.mubr.msk.f32.vlgmr.msra.gmra.mrb[2].mxu1 %vm310_vm11, %v2313_v0 }
 0x303   :  { %1925 = vmatprep.mubr.msk.bf16.mxu1 %vm2180_vm5, %v2181_v16 }
 0x3cb   :  { %v726_v33 = vpop.f32.mrb[8].mxu0 }
 0x3cc   :  { %2086 = vrcp.f32 %v726_v33  ;;  %v1914_v59 = vpop.f32.mrb[9].mxu0 }
 0x3cd   :  { %v505_v35 = vpop.f32.mrb[4].mxu1  ;;  %v729_v36 = vpop.f32.mrb[10].mxu0 }
 0x3ce   :  { %2088 = vrcp.f32 %v505_v35  ;;  %v1901_v37 = vpop.f32.mrb[5].mxu1  ;;  %v1915_v38 = vpop.f32.mrb[11].mxu0 }
 0x3cf   :  { %v508_v39 = vpop.f32.mrb[6].mxu1 }
 0x3d0   :  { %2090 = vrcp.f32 %v508_v39  ;;  %v1902_v40 = vpop.f32.mrb[7].mxu1 }
 0x3d1   :  { %2092 = vrcp.f32 %v729_v36 }
 0x3d5   :  { %v1922_v0 = vpop.f32.mrb[2].mxu1 }
 0x3d6   :  { %v2087_v43 = vpop.eup %2086  ;;  %v844_v45 = vsel %vm310_vm11, %v1922_v0, 1.0  ;;  %v834_v46 = vpop.f32.mrb[3].mxu1 }
 0x3d7   :  { %v843_v49 = vsel %vm310_vm11, %v834_v46, 1.0  ;;  %737 = vperm.xlu1 %2069, %v2087_v43  }
 0x3d8   :  { %v2089_v51 = vpop.eup %2088  ;;  %v845_v52 = vpack.c.bf16 %v844_v45, %v843_v49 }
 0x3d9   :  { %516 = vperm.xlu0 %2068, %v2089_v51  }
 0x3da   :  { %v2091_v53 = vpop.eup %2090  ;;  %1924 = vmatpush3.bf16.msra.mxu1 %v845_v52 }
 0x3db   :  { %521 = vperm.xlu1 %2069, %v2091_v53   ;;  %1942 = vmatprep.subr.bf16.mxu1 %v2181_v16  ;;  %v2093_v55 = vpop.eup %2092 }
 0x3dd   :  { %1926 = vmatmul.mubr.msk.bf16.vlgmr.msra.gmra.mrb[8].mxu1 %vm431_vm1, %v1776_v31  ;;  %2070 = vset.pattern.permute.xlu0 %v2185_v34 }
 0x3de   :  { %1943 = vmatpush3.bf16.msra.mxu1 %v1238_v54  ;;  %1944 = vmatprep.mubr.msk.bf16.mxu1 %vm2180_vm5, %v2181_v16 }
 0x3df   :  { %742 = vperm.xlu1 %2069, %v2093_v55   ;;  %1966 = vmatprep.subr.bf16.mxu1 %v2181_v16 }
 0x3e0   :  { %1108 = vperm.xlu0 %2070, %v49_v14  }
 0x456   :  { %v738_v56 = vpop.permute.xlu1 %737 }
 0x457   :  { %v745_v57 = vmul.f32 %v738_v56, %v726_v33  ;;  %v1779_v56 = vld [vmem:[#allocation2 + $0x62] ss:$0 sm:$0xff] }
 0x458   :  { %v517_v60 = vpop.permute.xlu0 %516 }
 0x459   :  { %v524_v2 = vmul.f32 %v517_v60, %v505_v35 }
 0x45a   :  { %v522_v20 = vpop.permute.xlu1 %521 }
 0x45b   :  { %v747_v61 = vadd.f32 %v745_v57, %v524_v2  ;;  %v525_v63 = vmul.f32 %v522_v20, %v508_v39  ;;  %v1780_v2 = vld [vmem:[#allocation2 + $0x63] ss:$0 sm:$0xff] }
 0x45e   :  { %v743_v62 = vpop.permute.xlu1 %742 }
 0x45f   :  { %v746_v1 = vmul.f32 %v743_v62, %v729_v36 }
 0x461   :  { %v748_v3 = vadd.f32 %v746_v1, %v525_v63 }
 0x4b0   :  { %v944_v4 = vpop.f32.mrb[8].mxu1 }
 0x4b1   :  { %2094 = vrcp.f32 %v944_v4  ;;  %v1927_v5 = vpop.f32.mrb[9].mxu1 }
 0x4b2   :  { %v947_v6 = vpop.f32.mrb[10].mxu1 }
 0x4b3   :  { %v1928_v7 = vpop.f32.mrb[11].mxu1  ;;  %2096 = vrcp.f32 %v947_v6 }
 0x4bb   :  { %v2095_v8 = vpop.eup %2094 }
 0x4bc   :  { %955 = vperm.xlu1 %2069, %v2095_v8  }
 0x4bd   :  { %v2097_v9 = vpop.eup %2096 }
 0x4c0   :  { %960 = vperm.xlu1 %2069, %v2097_v9   ;;  %v1288_v9 = vld [vmem:[#allocation2 + $0x80] sm:$0xff] }
 0x4c1   :  { %v1301_v12 = vpack.c.bf16 %v1289_v10, %v1288_v9  ;;  %v1298_v9 = vld [vmem:[#allocation2 + $0xd0] sm:$0xff]  ;;  %v1299_v10 = vld [vmem:[#allocation2 + $0xd8] sm:$0xff] }
 0x4c4   :  { %2071 = vset.pattern.permute.xlu1 %v2185_v34 }
 0x4c5   :  { %1113 = vperm.xlu1 %2071, %v50_v13   ;;  %v1291_v13 = vld [vmem:[#allocation2 + $0x98] sm:$0xff] }
 0x4c6   :  { %v1302_v14 = vpack.c.bf16 %v1291_v13, %v1290_v11  ;;  %v1306_v11 = vpack.c.bf16 %v1299_v10, %v1298_v9  ;;  %v1800_v9 = vld [vmem:[#allocation2 + $0x11b] ss:$0 sm:$0xff] }
 0x53b   :  { %v956_v34 = vpop.permute.xlu1 %955 }
 0x53c   :  { %v963_v58 = vmul.f32 %v956_v34, %v944_v4  ;;  %v1292_v34 = vld [vmem:[#allocation2 + $0xa0] sm:$0xff] }
 0x53e   :  { %v965_v18 = vadd.f32 %v963_v58, %v747_v61  ;;  %v1293_v58 = vld [vmem:[#allocation2 + $0xa8] sm:$0xff] }
 0x53f   :  { %v961_v19 = vpop.permute.xlu1 %960 }
 0x540   :  { %v972_v21 = vadd.f32 %v1778_v17, %v965_v18  ;;  %v964_v24 = vmul.f32 %v961_v19, %v947_v6  ;;  %v1296_v18 = vld [vmem:[#allocation2 + $0xc0] sm:$0xff]  ;;  %v1297_v19 = vld [vmem:[#allocation2 + $0xc8] sm:$0xff] }
 0x542   :  { %v966_v22 = vadd.f32 %v964_v24, %v748_v3  ;;  %v987_v23 = vmul.f32 %v972_v21, %v972_v21  ;;  %v976_v26 = vsel %vm310_vm11, %v972_v21, 0.0  ;;  %v1109_v3 = vpop.permute.xlu0 %1108 }
 0x544   :  { %v973_v25 = vadd.f32 %v1778_v17, %v966_v22  ;;  %v989_v30 = vsel %vm310_vm11, %v987_v23, 0.0  ;;  %v1114_v1 = vpop.permute.xlu1 %1113  ;;  %v1303_v17 = vpack.c.bf16 %v1293_v58, %v1292_v34  ;;  %v1786_v22 = vld [vmem:[#allocation2 + $0x73] ss:$0 sm:$0xff]  ;;  %v1789_v34 = vld [vmem:[#allocation2 + $0x7f] ss:$0 sm:$0xff] }
 0x546   :  { %v977_v27 = vsel %vm310_vm11, %v973_v25, 0.0  ;;  %v988_v28 = vmul.f32 %v973_v25, %v973_v25 }
 0x547   :  { %v978_v29 = vadd.f32 %v977_v27, %v976_v26 }
 0x548   :  { %v990_v31 = vsel %vm310_vm11, %v988_v28, 0.0 }
 0x549   :  { %v979_v32 = vrot.slane %v978_v29, 4  ;;  %v991_v33 = vadd.f32 %v990_v31, %v989_v30 }
 0x54b   :  { %v980_v59 = vadd.f32 %v979_v32, %v978_v29  ;;  %v992_v35 = vrot.slane %v991_v33, 4 }
 0x54d   :  { %v981_v36 = vrot.slane %v980_v59, 2  ;;  %v993_v37 = vadd.f32 %v992_v35, %v991_v33 }
 0x54f   :  { %v982_v38 = vadd.f32 %v981_v36, %v980_v59  ;;  %v994_v39 = vrot.slane %v993_v37, 2 }
 0x551   :  { %v983_v40 = vrot.slane %v982_v38, 1  ;;  %v995_v41 = vadd.f32 %v994_v39, %v993_v37 }
 0x553   :  { %v984_v42 = vadd.f32 %v983_v40, %v982_v38  ;;  %v996_v0 = vrot.slane %v995_v41, 1 }
 0x555   :  { %v986_v43 = vmul.f32 0.0625, %v984_v42  ;;  %v997_v44 = vadd.f32 %v996_v0, %v995_v41 }
 0x557   :  { %v998_v45 = vmul.f32 0.0625, %v997_v44  ;;  %v999_v46 = vmul.f32 %v986_v43, %v986_v43  ;;  %v1003_v49 = vsub.f32 %v973_v25, %v986_v43  ;;  %v1002_v51 = vsub.f32 %v972_v21, %v986_v43 }
 0x558   :  { %v1305_v21 = vpack.c.bf16 %v1297_v19, %v1296_v18 }
 0x559   :  { %v1000_v52 = vsub.f32 %v998_v45, %v999_v46 }
 0x55b   :  { %v1001_v53 = vmax.f32 %v1000_v52, 0.0 }
 0x55d   :  { %v1004_v54 = vadd.f32 1e-05, %v1001_v53 }
 0x55f   :  { %2098 = vrsqrt.f32 %v1004_v54 }
 0x569   :  { %v2099_v55 = vpop.eup %2098 }
 0x56a   :  { %v1007_v57 = vmul.f32 %v2099_v55, %v1003_v49  ;;  %v1006_v60 = vmul.f32 %v2099_v55, %v1002_v51 }
 0x56c   :  { %v1012_v20 = vmul.f32 %v1779_v56, %v1006_v60  ;;  %v1013_v61 = vmul.f32 %v1779_v56, %v1007_v57 }
 0x56e   :  { %v1018_v62 = vadd.f32 %v1780_v2, %v1012_v20  ;;  %v1019_v63 = vadd.f32 %v1780_v2, %v1013_v61 }
 0x570   :  { %1933 = vmatprep.mubr.msk.f32.mxu0 %vm310_vm11, %v1018_v62  ;;  %v1787_v62 = vld [vmem:[#allocation2 + $0x74] ss:$0 sm:$0xff] }
 0x571   :  { %1934 = vmatmul.mubr.msk.f32.vlgmr.msra.gmra.mrb[12].mxu0 %vm310_vm11, %v1019_v63 }
 0x572   :  { %1938 = vmatprep.mubr.msk.bf16.mxu0 %vm2180_vm5, %v2181_v16 }
 0x644   :  { %v1935_v4 = vpop.f32.mrb[12].mxu0 }
 0x645   :  { %v1117_v5 = vmul.f32 %v1935_v4, %v1114_v1  ;;  %v1097_v6 = vpop.f32.mrb[13].mxu0 }
 0x646   :  { %v1116_v7 = vmul.f32 %v1109_v3, %v1097_v6 }
 0x648   :  { %v1118_v8 = vpack.c.bf16 %v1117_v5, %v1116_v7 }
 0x64a   :  { %1937 = vmatpush3.bf16.msra.mxu0 %v1118_v8 }
 0x64b   :  { %1948 = vmatprep.subr.bf16.mxu0 %v2181_v16 }
 0x64d   :  { %1939 = vmatmul.mubr.msk.bf16.vlgmr.msra.gmra.mrb[16].mxu0 %vm431_vm1, %v1784_v50  ;;  %v1304_v50 = vpack.c.bf16 %v1295_v48, %v1294_v47 }
 0x64e   :  { %1962 = vmatprep.mubr.msk.bf16.mxu0 %vm2180_vm5, %v2181_v16  ;;  %1949 = vmatpush3.bf16.msra.mxu0 %v1301_v12  ;;  %v1300_v12 = vld [vmem:[#allocation2 + $0xe0] sm:$0xf] }
 0x64f   :  { %1950 = vmatprep.subr.bf16.mxu0 %v2181_v16  ;;  %v1307_v13 = vpack.c.bf16 %v1300_v12, %v1300_v12 }
 0x652   :  { %1951 = vmatpush3.bf16.msra.mxu0 %v1302_v14  ;;  %v1318_v14 = vsel %vm755_vm3, %v1307_v13, 0 }
 0x653   :  { %1952 = vmatprep.subr.bf16.mxu0 %v2181_v16 }
 0x656   :  { %1953 = vmatpush3.bf16.msra.mxu0 %v1303_v17 }
 0x657   :  { %1954 = vmatprep.subr.bf16.mxu0 %v2181_v16 }
 0x65a   :  { %1955 = vmatpush3.bf16.msra.mxu0 %v1304_v50 }
 0x65b   :  { %1956 = vmatprep.subr.bf16.mxu0 %v2181_v16 }
 0x65e   :  { %1957 = vmatpush3.bf16.msra.mxu0 %v1305_v21 }
 0x65f   :  { %1958 = vmatprep.subr.bf16.mxu0 %v2181_v16 }
 0x662   :  { %1959 = vmatpush3.bf16.msra.mxu0 %v1306_v11 }
 0x663   :  { %1960 = vmatprep.subr.bf16.mxu0 %v2181_v16 }
 0x666   :  { %1961 = vmatpush3.bf16.msra.mxu0 %v1318_v14 }
 0x720   :  { %v1161_v24 = vpop.f32.mrb[16].mxu0 }
 0x721   :  { %v1168_v23 = vmul.f32 %v1161_v24, %v1109_v3  ;;  %v1940_v25 = vpop.f32.mrb[17].mxu0  ;;  %v1788_v3 = vld [vmem:[#allocation2 + $0x75] ss:$0 sm:$0xff] }
 0x722   :  { %v1164_v26 = vpop.f32.mrb[18].mxu0  ;;  %v1368_v25 = vld [vmem:[#allocation2 + $0xe5] sm:$0xf] }
 0x723   :  { %v1175_v27 = vadd.f32 %v1786_v22, %v1168_v23  ;;  %v1169_v28 = vmul.f32 %v1164_v26, %v1114_v1  ;;  %v1941_v29 = vpop.f32.mrb[19].mxu0  ;;  %v1369_v26 = vpack.c.bf16 %v1368_v25, %v1368_v25 }
 0x725   :  { %v1190_v30 = vmul.f32 %v1175_v27, %v1175_v27  ;;  %v1176_v31 = vadd.f32 %v1786_v22, %v1169_v28  ;;  %v1180_v33 = vsel %vm1179_vm4, %v1175_v27, 0.0  ;;  %v1791_v28 = vld [vmem:[#allocation2 + $0xe4] ss:$0 sm:$0xff] }
 0x727   :  { %v1191_v32 = vmul.f32 %v1176_v31, %v1176_v31  ;;  %v1181_v59 = vsel %vm1179_vm4, %v1176_v31, 0.0  ;;  %v1192_v36 = vsel %vm1179_vm4, %v1190_v30, 0.0 }
 0x728   :  { %v1182_v35 = vadd.f32 %v1181_v59, %v1180_v33 }
 0x729   :  { %v1193_v37 = vsel %vm1179_vm4, %v1191_v32, 0.0 }
 0x72a   :  { %v1183_v38 = vrot.slane %v1182_v35, 4  ;;  %v1194_v39 = vadd.f32 %v1193_v37, %v1192_v36 }
 0x72c   :  { %v1184_v40 = vadd.f32 %v1183_v38, %v1182_v35  ;;  %v1195_v41 = vrot.slane %v1194_v39, 4 }
 0x72e   :  { %v1185_v42 = vrot.slane %v1184_v40, 2  ;;  %v1196_v0 = vadd.f32 %v1195_v41, %v1194_v39 }
 0x730   :  { %v1186_v43 = vadd.f32 %v1185_v42, %v1184_v40  ;;  %v1197_v44 = vrot.slane %v1196_v0, 2  ;;  %v2073_v42 = vld [vmem:[%s2453_s4] sm:$0xff]  }
 0x732   :  { %v1187_v45 = vrot.slane %v1186_v43, 1  ;;  %v1198_v46 = vadd.f32 %v1197_v44, %v1196_v0 }
 0x734   :  { %v1188_v49 = vadd.f32 %v1187_v45, %v1186_v43  ;;  %v1199_v51 = vrot.slane %v1198_v46, 1  ;;  %v1471_v45 = vld [vmem:[#allocation2 + $0xe9] sm:$0xff] }
 0x736   :  { %v1189_v52 = vmul.f32 0.0625, %v1188_v49  ;;  %v1200_v53 = vadd.f32 %v1199_v51, %v1198_v46  ;;  %v1472_v46 = vld [vmem:[#allocation2 + $0xf1] sm:$0xff]  ;;  %v1427_v51 = vld [vmem:[%s2452_s3] sm:$0x1]  ;;  %s2190_s3 = smov [#allocation5]  }
 0x737   :  { %s1722_s4 = sshll.u32 %s2190_s3, 4  ;;  %s1723_s4 = int_to_ptr.vmem [resolvable:$true] %s1722_s4 }
 0x738   :  { %v1201_v54 = vmul.f32 0.0625, %v1200_v53  ;;  %v1202_v55 = vmul.f32 %v1189_v52, %v1189_v52  ;;  %v1205_v56 = vsub.f32 %v1175_v27, %v1189_v52  ;;  %v1206_v57 = vsub.f32 %v1176_v31, %v1189_v52  ;;  %v1473_v53 = vld [vmem:[#allocation2 + $0xf9] sm:$0xff]  ;;  %s2124_s8 = scalar_lea.vmem %s1723_s4, 32  ;;  %p2129_p9 = scmp.lt.s32.totalorder %s1723_s4, %s1723_s4 }
 0x739   :  { %v1374_v27 = vsel %vm755_vm3, %v1369_v26, 0  ;;  %v2042_v52 = vpack.c.bf16 %v1472_v46, %v1471_v45  ;;  %p2125_p8 = scmp.ne.s32.totalorder %s1723_s4, %s2124_s8  ;;  %p2130_p10 = scmp.lt.s32.totalorder %s2124_s8, %s2124_s8 }
 0x73a   :  { %v1203_v60 = vsub.f32 %v1201_v54, %v1202_v55  ;;  %v1474_v54 = vld [vmem:[#allocation2 + $0x101] sm:$0xff] }
 0x73b   :  { %v2045_v55 = vpack.c.bf16 %v1474_v54, %v1473_v53  ;;  %p2131_p11 = por %p2130_p10, %p2129_p9 }
 0x73c   :  { %v1204_v2 = vmax.f32 %v1203_v60, 0.0 }
 0x73d   :  { %p2132_p12 = pnand %p2131_p11, %p2125_p8 }
 0x73e   :  { %v1207_v20 = vadd.f32 1e-05, %v1204_v2 }
 0x740   :  { %2100 = vrsqrt.f32 %v1207_v20  ;;  %v1557_v20 = vld [vmem:[#allocation2 + $0x10a] sm:$0xff] }
 0x74a   :  { %v2101_v61 = vpop.eup %2100 }
 0x74b   :  { %v1209_v63 = vmul.f32 %v2101_v61, %v1205_v56  ;;  %v1210_v1 = vmul.f32 %v2101_v61, %v1206_v57  ;;  %v1796_v61 = vld [vmem:[#allocation2 + $0x109] ss:$0 sm:$0xff] }
 0x74d   :  { %v1215_v4 = vmul.f32 %v1787_v62, %v1209_v63  ;;  %v1216_v5 = vmul.f32 %v1787_v62, %v1210_v1 }
 0x74f   :  { %v1221_v6 = vadd.f32 %v1788_v3, %v1215_v4  ;;  %v1222_v7 = vadd.f32 %v1788_v3, %v1216_v5  ;;  %v1639_v3 = vld [vmem:[#allocation2 + $0x113] sm:$0xff]  ;;  %v1798_v5 = vld [vmem:[#allocation2 + $0x112] ss:$0 sm:$0xff] }
 0x751   :  { %v1223_v8 = vpack.c.bf16 %v1222_v7, %v1221_v6 }
 0x753   :  { %1945 = vmatmul.mubr.msk.bf16.vlgmr.msra.gmra.mrb[12].mxu1 %vm1179_vm4, %v1223_v8 }
 0x754   :  { %1968 = vmatprep.mubr.msk.bf16.mxu1 %vm2180_vm5, %v2181_v16  ;;  %1967 = vmatpush3.bf16.msra.mxu1 %v1374_v27 }
 0x755   :  { %1972 = vmatprep.subr.bf16.mxu1 %v2181_v16 }
 0x826   :  { %v1274_v58 = vpop.f32.mrb[12].mxu1 }
 0x827   :  { %v1275_v17 = vadd.f32 %v1789_v34, %v1274_v58  ;;  %v1946_v47 = vpop.f32.mrb[13].mxu1 }
 0x828   :  { %v1277_v48 = vpop.f32.mrb[14].mxu1 }
 0x829   :  { %v1283_v50 = vmul.f32 0.01, %v1275_v17  ;;  %v1278_v18 = vadd.f32 %v1789_v34, %v1277_v48  ;;  %v1947_v19 = vpop.f32.mrb[15].mxu1  ;;  %vm1281_vm6 = vcmp.gt.f32.partialorder %v1275_v17, 0.0 }
 0x82b   :  { %vm1282_vm7 = vcmp.gt.f32.partialorder %v1278_v18, 0.0  ;;  %v1284_v21 = vmul.f32 0.01, %v1278_v18  ;;  %v1285_v24 = vsel %vm1281_vm6, %v1275_v17, %v1283_v50 }
 0x82d   :  { %v1286_v22 = vsel %vm1282_vm7, %v1278_v18, %v1284_v21 }
 0x82e   :  { %v1287_v23 = vpack.c.bf16 %v1286_v22, %v1285_v24 }
 0x830   :  { %1963 = vmatmul.mubr.msk.bf16.vlgmr.msra.gmra.mrb[20].mxu0 %vm1313_vm8, %v1287_v23 }
 0x903   :  { %v1354_v29 = vpop.f32.mrb[20].mxu0 }
 0x904   :  { %v1355_v30 = vadd.f32 %v1791_v28, %v1354_v29  ;;  %v1964_v31 = vpop.f32.mrb[21].mxu0 }
 0x905   :  { %v1357_v32 = vpop.f32.mrb[22].mxu0 }
 0x906   :  { %v1363_v33 = vmul.f32 0.01, %v1355_v30  ;;  %v1358_v59 = vadd.f32 %v1791_v28, %v1357_v32  ;;  %v1965_v35 = vpop.f32.mrb[23].mxu0  ;;  %vm1361_vm9 = vcmp.gt.f32.partialorder %v1355_v30, 0.0 }
 0x908   :  { %vm1362_vm10 = vcmp.gt.f32.partialorder %v1358_v59, 0.0  ;;  %v1364_v36 = vmul.f32 0.01, %v1358_v59  ;;  %v1365_v37 = vsel %vm1361_vm9, %v1355_v30, %v1363_v33 }
 0x90a   :  { %v1366_v38 = vsel %vm1362_vm10, %v1358_v59, %v1364_v36 }
 0x90b   :  { %v1367_v39 = vpack.c.bf16 %v1366_v38, %v1365_v37 }
 0x90d   :  { %1969 = vmatmul.mubr.msk.bf16.vlgmr.msra.gmra.mrb[16].mxu1 %vm52_vm2, %v1367_v39  ;;  %vm1480_vm2 = vcmask 261120  }
 0x90e   :  { %1974 = vmatprep.mubr.msk.bf16.mxu1 %vm2180_vm5, %v2181_v16 }
 0x9e0   :  { %v1410_v40 = vpop.f32.mrb[16].mxu1 }
 0x9e1   :  { %v1970_v41 = vpop.f32.mrb[17].mxu1 }
 0x9e2   :  { %v1413_v0 = vpop.f32.mrb[18].mxu1 }
 0x9e3   :  { %v1417_v43 = vpack.c.bf16 %v1413_v0, %v1410_v40  ;;  %v1971_v44 = vpop.f32.mrb[19].mxu1 }
 0x9e5   :  { %v1426_v49 = vmul.bf16 %v2073_v42, %v1417_v43 }
 0x9e7   :  { %1973 = vmatpush3.bf16.msra.mxu1 %v1426_v49 }
 0x9e8   :  { %2041 = vmatprep.subr.bf16.mxu1 %v2179_v15 }
 0x9ea   :  { %1975 = vmatmul.mubr.msk.bf16.vlgmr.msra.gmra.mrb[20].mxu1 %vm431_vm1, %v1427_v51 }
 0x9eb   :  { %2043 = vmatpush3.bf16.msra.mxu1 %v2042_v52  ;;  %1986 = vmatprep.mubr.msk.f32.mxu1 %vm2180_vm5, %v2181_v16 }
 0x9ec   :  { %2044 = vmatprep.subr.bf16.mxu1 %v2179_v15 }
 0x9ef   :  { %2046 = vmatpush3.bf16.msra.mxu1 %v2045_v55 }
 0x9f0   :  { %1989 = vmatprep.subr.mxu1 %v2181_v16 }
 0xabd   :  { %v1465_v56 = vpop.f32.mrb[20].mxu1 }
 0xabe   :  { %1987 = vmatmul.mubr.msk.f32.vlgmr.msra.gmra.mrb[24].mxu1 %vm1480_vm2, %v1465_v56  ;;  %v1976_v57 = vpop.f32.mrb[21].mxu1 }
 0xabf   :  { %v1468_v60 = vpop.f32.mrb[22].mxu1  ;;  %1991 = vmatprep.mubr.msk.f32.mxu1 %vm2180_vm5, %v2181_v16  ;;  %1990 = vmatpush3.msra.mxu1 %v1557_v20 }
 0xac0   :  { %v1977_v2 = vpop.f32.mrb[23].mxu1  ;;  %1994 = vmatprep.subr.mxu1 %v2181_v16 }
 0xb91   :  { %v1550_v62 = vpop.f32.mrb[24].mxu1 }
 0xb92   :  { %v1551_v63 = vadd.f32 %v1796_v61, %v1550_v62  ;;  %v1988_v15 = vpop.f32.mrb[25].mxu1 }
 0xb94   :  { %vm1554_vm11 = vcmp.gt.f32.partialorder %v1551_v63, 0.0  ;;  %v1555_v1 = vmul.f32 0.01, %v1551_v63 }
 0xb96   :  { %v1556_v4 = vsel %vm1554_vm11, %v1551_v63, %v1555_v1 }
 0xb97   :  { %1992 = vmatmul.mubr.msk.f32.vlgmr.msra.gmra.mrb[26].mxu1 %vm1563_vm12, %v1556_v4 }
 0xb98   :  { %1995 = vmatpush3.msra.mxu1 %v1639_v3  ;;  %1996 = vmatprep.mubr.msk.f32.mxu1 %vm2180_vm5, %v2181_v16 }
 0xb9b   :  { %1997 = vmatmul.mubr.msk.f32.vlgmr.msra.gmra.mrb[28].mxu1 %vm1563_vm12, %v1556_v4 }
 0xc6a   :  { %v1633_v6 = vpop.f32.mrb[26].mxu1 }
 0xc6b   :  { %v1634_v7 = vadd.f32 %v1798_v5, %v1633_v6  ;;  %v1993_v8 = vpop.f32.mrb[27].mxu1 }
 0xc6d   :  { %1638 = vst.msk [vmem:[#allocation5] sm:$0x3] %vm1637_vm13, %v1634_v7 }
 0xc6e   :  { %v1711_v10 = vpop.f32.mrb[28].mxu1 }
 0xc6f   :  { %2135 = shalt.err (!%p2132_p12)
}
 0xc70   :  { %s2136_s11 = scalar_lea.hbm %s2455_s6, 32 }
 0xc71   :  { %p2137_p13 = scmp.ne.s32.totalorder %s2455_s6, %s2136_s11  ;;  %p2140_p0 = scmp.lt.u32.totalorder %s2136_s11, %s2455_s6 }
 0xc73   :  { %p2142_p1 = pnand %p2140_p0, %p2137_p13 }
 0xc75   :  { %2145 = shalt.err (!%p2142_p1)
}
 0xc76   :  { %1725 = dma.vmem_to_hbm [thread:$0]  %s1723_s4, 32, %s2455_s6, [#allocation4]   ;;  %v1712_v16 = vadd.f32 %v1800_v9, %v1711_v10  ;;  %v1998_v11 = vpop.f32.mrb[29].mxu1 }
 0xc77   :  { %s2146_s18 = scalar_lea.vmem %s1733_s30, 32  ;;  %p2151_p3 = scmp.lt.s32.totalorder %s1733_s30, %s1733_s30 }
 0xc78   :  { %1715 = vst.msk [vmem:[#allocation6] sm:$0x3] %vm1637_vm13, %v1712_v16  ;;  %p2147_p2 = scmp.ne.s32.totalorder %s1733_s30, %s2146_s18  ;;  %p2152_p4 = scmp.lt.s32.totalorder %s2146_s18, %s2146_s18 }
 0xc7a   :  { %p2153_p5 = por %p2152_p4, %p2151_p3 }
 0xc7c   :  { %p2154_p6 = pnand %p2153_p5, %p2147_p2 }
 0xc7e   :  { %2157 = shalt.err (!%p2154_p6)
}
 0xc7f   :  { %s2158_s19 = scalar_lea.hbm %s2456_s7, 32 }
 0xc80   :  { %p2159_p7 = scmp.ne.s32.totalorder %s2456_s7, %s2158_s19  ;;  %p2162_p8 = scmp.lt.u32.totalorder %s2158_s19, %s2456_s7 }
 0xc82   :  { %p2164_p9 = pnand %p2162_p8, %p2159_p7 }
 0xc84   :  { %2167 = shalt.err (!%p2164_p9)
}
 0xc85   :  { %1735 = dma.vmem_to_hbm [thread:$0]  %s1733_s30, 32, %s2456_s7, [#allocation7]  }
 0xc86   :  { %2170 = dma.done.wait [#allocation4], 32  }
 0xc87   :  { %2171 = vsyncadd [#allocation4], 4294967264 }
 0xc88   :  { %2172 = dma.done.wait [#allocation7], 32  }
 0xc89   :  { %2173 = vsyncadd [#allocation7], 4294967264 }
 0xc8a   :  { %1742 = vsyncpa [#allocation3], 1 }
 0xc8b   :  { %1743 = vsyncpa [#allocation4], 1 }
 0xc8c   :  { %1744 = vsyncpa [#allocation7], 1 }

</bundles_post_ra>
